<compile_context>
chip_gen: v7x
topology: tpu7x:2x2x1
jax: 0.10.0
libtpu: 0.0.40
codegen_flags: <defaults>
</compile_context>

<pallas_src>
import jax
import jax.numpy as jnp
from jax import lax
from jax.experimental import pallas as pl
from jax.experimental.pallas import tpu as pltpu

LANE = 128
SUBLANE = 8


def _vmem_limit_bytes():
    """Generation-dependent scoped-VMEM budget (leave DMA headroom)."""
    cap = 128 * 1024 * 1024
    try:
        cap = int(pltpu.get_tpu_info().vmem_capacity_bytes)
    except Exception:
        pass
    return max(32 * 1024 * 1024, min(int(cap * 3 // 4), 112 * 1024 * 1024))


def _mhsa_body(xt_ref, wqkv_ref, bqkv_ref, mask_ref, rel_ref, o_ref, qkv_ref,
               *, heads, dh, sq):
    """One batch step.

    xt_ref  : (Sp, C)    bf16  input, sequence-major, key axis padded to 128
    wqkv_ref: (C, 3C)    bf16  fused [Wq | Wk | Wv]^T
    bqkv_ref: (1, 3C)    f32   fused biases
    mask_ref: (1, Sp)    f32   additive key-pad bias (0 / -1e30) or None
    rel_ref : (Sp, C)    bf16  per-head relative pos embeddings or None
    o_ref   : (Sq, C)    f32   output, sequence-major
    qkv_ref : (Sp, 3C)   bf16  VMEM scratch for the fused projection
    """
    C = heads * dh
    xt = xt_ref[...]                                              # (Sp, C)

    # Fused QKV projection for all heads (NN dot; N = 3C fills the MXU width,
    # x streamed through the MXU exactly once).
    qkv = lax.dot_general(xt, wqkv_ref[...], (((1,), (0,)), ((), ())),
                          preferred_element_type=jnp.float32)
    qkv = qkv + bqkv_ref[...]                                     # (Sp, 3C) f32
    qkv_ref[...] = qkv.astype(jnp.bfloat16)                       # stage in VMEM

    mask = mask_ref[...] if mask_ref is not None else None        # (1, Sp) f32
    rel = rel_ref[...] if rel_ref is not None else None           # (Sp, C) bf16

    for h in range(heads):                                        # static unroll
        if rel is not None:
            q_full = qkv_ref[:, h * dh:(h + 1) * dh]              # (Sp, dh)
            q = q_full[:sq, :]                                     # (Sq, dh)
        else:
            q = qkv_ref[:sq, h * dh:(h + 1) * dh]                  # (Sq, dh)
        k = qkv_ref[:, C + h * dh:C + (h + 1) * dh]                # (Sp, dh)
        v = qkv_ref[:, 2 * C + h * dh:2 * C + (h + 1) * dh]        # (Sp, dh)

        # content_content[i, j] = sum_d q[i, d] * k[j, d]          (NT dot)
        energy = lax.dot_general(q, k, (((1,), (1,)), ((), ())),
                                 preferred_element_type=jnp.float32)  # (Sq, Sp)
        if rel is not None:
            # content_position[i, j] = sum_d rel[i, d] * q[j, d]   (NT dot)
            rel_h = rel[:sq, h * dh:(h + 1) * dh]                  # (Sq, dh)
            energy = energy + lax.dot_general(
                rel_h, q_full, (((1,), (1,)), ((), ())),
                preferred_element_type=jnp.float32)
        if mask is not None:
            # Additive -1e30 on padded key columns, BEFORE the row max so the
            # masked exps underflow to exactly 0.
            energy = energy + mask

        # Numerically stable softmax over keys, f32, normalization deferred.
        m = jnp.max(energy, axis=-1, keepdims=True)                # (Sq, 1)
        e = jnp.exp(energy - m)                                    # (Sq, Sp)
        denom = jnp.sum(e, axis=-1, keepdims=True)                 # (Sq, 1)

        # Unnormalized PV matmul (NN dot), then O(Sq*dh) rescale (EUP recip).
        out_h = lax.dot_general(e.astype(jnp.bfloat16), v,
                                (((1,), (0,)), ((), ())),
                                preferred_element_type=jnp.float32)  # (Sq, dh)
        out_h = out_h * pl.reciprocal(denom, approx=True)
        o_ref[:, h * dh:(h + 1) * dh] = out_h.astype(o_ref.dtype)


def _make_mhsa_kernel(*, heads, dh, sq, masked, pos):
    def kernel(*refs):
        it = iter(refs)
        xt_ref = next(it)
        wqkv_ref = next(it)
        bqkv_ref = next(it)
        mask_ref = next(it) if masked else None
        rel_ref = next(it) if pos else None
        o_ref = next(it)
        qkv_ref = next(it)
        _mhsa_body(xt_ref, wqkv_ref, bqkv_ref, mask_ref, rel_ref, o_ref,
                   qkv_ref, heads=heads, dh=dh, sq=sq)
    return kernel


def mhsa_forward(x, wq, bq, wk, bk, wv, bv, *, heads, rel_h=None, rel_w=None):
    """MHSA forward. x: (N, C, W, H) float32 (NCHW, like PyTorch)."""
    N, C, W, H = x.shape
    S = W * H
    dh = C // heads
    Sp = pl.cdiv(S, LANE) * LANE          # key axis: lane-dense pad
    Sq = pl.cdiv(S, SUBLANE) * SUBLANE    # query axis: sublane pad only
    masked = Sp != S
    pos = rel_h is not None

    # --- wrapper-side layout plumbing (bf16 first: halves HBM traffic) -----
    xb = x.astype(jnp.bfloat16).reshape(N, C, S)
    if masked:
        xb = jnp.pad(xb, ((0, 0), (0, 0), (0, Sp - S)))
    xt = jnp.transpose(xb, (0, 2, 1))                              # (N, Sp, C)

    # Fused QKV weights: qkv = xt @ Wqkv, columns = [q heads | k heads | v heads]
    wqkv = jnp.concatenate([wq, wk, wv], axis=0).T.astype(jnp.bfloat16)   # (C, 3C)
    bqkv = jnp.concatenate([bq, bk, bv])[None, :].astype(jnp.float32)     # (1, 3C)

    args = [xt, wqkv, bqkv]
    in_specs = [
        pl.BlockSpec((None, Sp, C), lambda b: (b, 0, 0)),          # x (per batch)
        pl.BlockSpec((C, 3 * C), lambda b: (0, 0)),                # Wqkv (resident)
        pl.BlockSpec((1, 3 * C), lambda b: (0, 0)),                # bqkv
    ]
    if masked:
        mask = jnp.where(jnp.arange(Sp) < S, 0.0, -1e30).astype(jnp.float32)
        args.append(mask[None, :])                                 # (1, Sp)
        in_specs.append(pl.BlockSpec((1, Sp), lambda b: (0, 0)))
    if pos:
        # (rel_h + rel_w).view(1, heads, dh, W*H), sequence-major per head.
        # TODO(synk): torch slices content_position when the learned pos-emb
        # spatial size differs from the input; here we assume they match.
        rel = (rel_h + rel_w).reshape(heads, dh, S)
        relt = jnp.transpose(rel, (2, 0, 1)).reshape(S, C)         # (S, heads*dh)
        if masked:
            relt = jnp.pad(relt, ((0, Sp - S), (0, 0)))
        args.append(relt.astype(jnp.bfloat16))                     # (Sp, C)
        in_specs.append(pl.BlockSpec((Sp, C), lambda b: (0, 0)))

    kernel = _make_mhsa_kernel(heads=heads, dh=dh, sq=Sq, masked=masked, pos=pos)

    out = pl.pallas_call(
        kernel,
        out_shape=jax.ShapeDtypeStruct((N, Sq, C), x.dtype),
        grid=(N,),
        in_specs=in_specs,
        out_specs=pl.BlockSpec((None, Sq, C), lambda b: (b, 0, 0)),
        scratch_shapes=[pltpu.VMEM((Sp, 3 * C), jnp.bfloat16)],
        compiler_params=pltpu.CompilerParams(
            dimension_semantics=("parallel",),
            # TODO(synk): for Sp >= ~1024 (v7x, 64 MiB VMEM) / ~2048 (v5e/v6e)
            # tile the key axis with an online softmax instead of materializing
            # the (Sq, Sp) energy/exp temporaries.
            vmem_limit_bytes=_vmem_limit_bytes()),
    )(*args)

    out = out[:, :S, :]                                            # (N, S, C)
    return jnp.transpose(out, (0, 2, 1)).reshape(N, C, W, H)


def mhsa_reference(x, wq, bq, wk, bk, wv, bv, *, heads, rel_h=None, rel_w=None):
    """Pure-JAX f32 mirror of the PyTorch forward, for correctness checking."""
    N, C, W, H = x.shape
    S = W * H
    dh = C // heads
    xf = x.reshape(N, C, S)

    def proj(w, b):
        return (jnp.einsum('oc,ncs->nos', w, xf) + b[None, :, None]
                ).reshape(N, heads, dh, S)

    q = proj(wq, bq)
    k = proj(wk, bk)
    v = proj(wv, bv)
    energy = jnp.einsum('bhdi,bhdj->bhij', q, k)
    if rel_h is not None:
        rel = (rel_h + rel_w).reshape(heads, dh, S)
        energy = energy + jnp.einsum('hdi,bhdj->bhij', rel, q)
    attn = jax.nn.softmax(energy, axis=-1)
    out = jnp.einsum('bhdj,bhij->bhdi', v, attn)
    return out.reshape(N, C, W, H)


if __name__ == "__main__":
    key = jax.random.PRNGKey(0)
    # Kernel uses bf16 MXU compute (f32 accumulation / f32 softmax), so
    # compare against the f32 reference at bf16-level tolerance.
    TOL = dict(atol=3e-2, rtol=3e-2)

    def run_case(case_key, N, C, W, H, heads, pos):
        dh = C // heads
        ks = jax.random.split(case_key, 9)
        x = jax.random.normal(ks[0], (N, C, W, H), jnp.float32)
        # Deterministic synthetic parameters (shapes follow nn.Conv2d(C, C, 1)).
        wq = jax.random.normal(ks[1], (C, C), jnp.float32) * 0.1
        bq = jax.random.normal(ks[2], (C,), jnp.float32) * 0.1
        wk = jax.random.normal(ks[3], (C, C), jnp.float32) * 0.1
        bk = jax.random.normal(ks[4], (C,), jnp.float32) * 0.1
        wv = jax.random.normal(ks[5], (C, C), jnp.float32) * 0.1
        bv = jax.random.normal(ks[6], (C,), jnp.float32) * 0.1
        rh = rw = None
        if pos:
            rh = jax.random.normal(ks[7], (1, heads, dh, 1, H), jnp.float32) * 0.1
            rw = jax.random.normal(ks[8], (1, heads, dh, W, 1), jnp.float32) * 0.1
        out = mhsa_forward(x, wq, bq, wk, bk, wv, bv, heads=heads,
                           rel_h=rh, rel_w=rw)
        jax.block_until_ready(out)
        ref = mhsa_reference(x, wq, bq, wk, bk, wv, bv, heads=heads,
                             rel_h=rh, rel_w=rw)
        assert out.shape == (N, C, W, H)
        err = float(jnp.max(jnp.abs(out - ref)))
        assert jnp.allclose(out, ref, **TOL), err

    keys = jax.random.split(key, 3)
    # Padded key axis (S=64 -> Sp=128), pos_emb=False (module default).
    run_case(keys[0], N=2, C=32, W=8, H=8, heads=4, pos=False)
    # Padded key axis + relative position embeddings.
    run_case(keys[1], N=2, C=32, W=8, H=8, heads=4, pos=True)
    # Lane-exact spatial size (S=256 == Sp): unmasked code path.
    run_case(keys[2], N=1, C=32, W=16, H=16, heads=4, pos=False)

    print("KERNEL_OK")
</pallas_src>

<mosaic_0001>
module attributes {stable_mosaic.version = 11 : i64} {
  func.func @kernel(%arg0: i32, %arg1: memref<1x128x32xbf16, #tpu.memory_space<vmem>>, %arg2: memref<32x96xbf16, #tpu.memory_space<vmem>>, %arg3: memref<1x96xf32, #tpu.memory_space<vmem>>, %arg4: memref<1x128xf32, #tpu.memory_space<vmem>>, %arg5: memref<1x64x32xf32, #tpu.memory_space<vmem>>, %arg6: memref<128x96xbf16, #tpu.memory_space<vmem>>) attributes {dimension_semantics = [#tpu.dimension_semantics<parallel>], iteration_bounds = array<i64: 2>, scalar_prefetch = 0 : i64, scratch_operands = 1 : i64, tpu.core_type = #tpu.core_type<tc>, window_params = [{transform_indices = @transform_0, window_bounds = array<i64: 1, 128, 32>}, {pipeline_mode = #tpu.pipeline_mode<synchronous>, transform_indices = @transform_1, window_bounds = array<i64: 32, 96>}, {pipeline_mode = #tpu.pipeline_mode<synchronous>, transform_indices = @transform_2, window_bounds = array<i64: 1, 96>}, {pipeline_mode = #tpu.pipeline_mode<synchronous>, transform_indices = @transform_3, window_bounds = array<i64: 1, 128>}, {transform_indices = @transform_4, window_bounds = array<i64: 1, 64, 32>}]} {
    %c0 = arith.constant 0 : index
    %c0_0 = arith.constant 0 : index
    %c0_1 = arith.constant 0 : index
    %0 = vector.load %arg1[%c0, %c0_0, %c0_1] : memref<1x128x32xbf16, #tpu.memory_space<vmem>>, vector<1x128x32xbf16>
    %1 = vector.shape_cast %0 : vector<1x128x32xbf16> to vector<128x32xbf16>
    %c0_2 = arith.constant 0 : index
    %c0_3 = arith.constant 0 : index
    %2 = vector.load %arg2[%c0_2, %c0_3] : memref<32x96xbf16, #tpu.memory_space<vmem>>, vector<32x96xbf16>
    %cst = arith.constant dense<0.000000e+00> : vector<128x96xf32>
    %3 = tpu.matmul %1, %2, %cst {dimension_numbers = #tpu.dot_dimension_numbers<[1], [0], [0], [1], [0, 0, 1, 1], [], []>} : vector<128x32xbf16>, vector<32x96xbf16>, vector<128x96xf32> -> vector<128x96xf32>
    %c0_4 = arith.constant 0 : index
    %c0_5 = arith.constant 0 : index
    %4 = vector.load %arg3[%c0_4, %c0_5] : memref<1x96xf32, #tpu.memory_space<vmem>>, vector<1x96xf32>
    %5 = vector.broadcast %4 : vector<1x96xf32> to vector<128x96xf32>
    %6 = arith.addf %3, %5 : vector<128x96xf32>
    %7 = arith.truncf %6 : vector<128x96xf32> to vector<128x96xbf16>
    %c0_6 = arith.constant 0 : index
    %c0_7 = arith.constant 0 : index
    %8 = vector.load %arg6[%c0_6, %c0_7] : memref<128x96xbf16, #tpu.memory_space<vmem>>, vector<128x96xbf16>
    tpu.vector_store %arg6[%c0_6, %c0_7], %7 {strides = array<i32>} : memref<128x96xbf16, #tpu.memory_space<vmem>>, vector<128x96xbf16>,
    %c0_8 = arith.constant 0 : index
    %c0_9 = arith.constant 0 : index
    %9 = vector.load %arg4[%c0_8, %c0_9] : memref<1x128xf32, #tpu.memory_space<vmem>>, vector<1x128xf32>
    %c0_10 = arith.constant 0 : index
    %c0_11 = arith.constant 0 : index
    %10 = vector.load %arg6[%c0_10, %c0_11] : memref<128x96xbf16, #tpu.memory_space<vmem>>, vector<64x8xbf16>
    %c0_12 = arith.constant 0 : index
    %c32 = arith.constant 32 : index
    %11 = vector.load %arg6[%c0_12, %c32] : memref<128x96xbf16, #tpu.memory_space<vmem>>, vector<128x8xbf16>
    %c0_13 = arith.constant 0 : index
    %c64 = arith.constant 64 : index
    %12 = vector.load %arg6[%c0_13, %c64] : memref<128x96xbf16, #tpu.memory_space<vmem>>, vector<128x8xbf16>
    %cst_14 = arith.constant dense<0.000000e+00> : vector<64x128xf32>
    %13 = tpu.matmul %10, %11, %cst_14 {dimension_numbers = #tpu.dot_dimension_numbers<[1], [1], [0], [0], [0, 0, 1, 0], [], []>} : vector<64x8xbf16>, vector<128x8xbf16>, vector<64x128xf32> -> vector<64x128xf32>
    %14 = vector.broadcast %9 : vector<1x128xf32> to vector<64x128xf32>
    %15 = arith.addf %13, %14 : vector<64x128xf32>
    %cst_15 = arith.constant dense<0xFF800000> : vector<64xf32>
    %16 = vector.multi_reduction <maximumf>, %15, %cst_15 [1] : vector<64x128xf32> to vector<64xf32>
    %17 = vector.shape_cast %16 : vector<64xf32> to vector<64x1xf32>
    %18 = vector.broadcast %17 : vector<64x1xf32> to vector<64x128xf32>
    %19 = arith.subf %15, %18 : vector<64x128xf32>
    %20 = math.exp %19 : vector<64x128xf32>
    %cst_16 = arith.constant dense<0.000000e+00> : vector<64xf32>
    %21 = vector.multi_reduction <add>, %20, %cst_16 [1] : vector<64x128xf32> to vector<64xf32>
    %22 = vector.shape_cast %21 : vector<64xf32> to vector<64x1xf32>
    %23 = arith.truncf %20 : vector<64x128xf32> to vector<64x128xbf16>
    %cst_17 = arith.constant dense<0.000000e+00> : vector<64x8xf32>
    %24 = tpu.matmul %23, %12, %cst_17 {dimension_numbers = #tpu.dot_dimension_numbers<[1], [0], [0], [1], [0, 0, 1, 1], [], []>} : vector<64x128xbf16>, vector<128x8xbf16>, vector<64x8xf32> -> vector<64x8xf32>
    %25 = tpu.reciprocal %22 {approx = true} : vector<64x1xf32> -> vector<64x1xf32>
    %26 = vector.broadcast %25 : vector<64x1xf32> to vector<64x8xf32>
    %27 = arith.mulf %24, %26 : vector<64x8xf32>
    %c0_18 = arith.constant 0 : index
    %c0_19 = arith.constant 0 : index
    %c0_20 = arith.constant 0 : index
    %28 = vector.load %arg5[%c0_18, %c0_19, %c0_20] : memref<1x64x32xf32, #tpu.memory_space<vmem>>, vector<1x64x8xf32>
    %29 = vector.shape_cast %28 : vector<1x64x8xf32> to vector<64x8xf32>
    %30 = vector.shape_cast %27 : vector<64x8xf32> to vector<1x64x8xf32>
    tpu.vector_store %arg5[%c0_18, %c0_19, %c0_20], %30 {strides = array<i32>} : memref<1x64x32xf32, #tpu.memory_space<vmem>>, vector<1x64x8xf32>,
    %c0_21 = arith.constant 0 : index
    %c8 = arith.constant 8 : index
    %31 = vector.load %arg6[%c0_21, %c8] : memref<128x96xbf16, #tpu.memory_space<vmem>>, vector<64x8xbf16>
    %c0_22 = arith.constant 0 : index
    %c40 = arith.constant 40 : index
    %32 = vector.load %arg6[%c0_22, %c40] : memref<128x96xbf16, #tpu.memory_space<vmem>>, vector<128x8xbf16>
    %c0_23 = arith.constant 0 : index
    %c72 = arith.constant 72 : index
    %33 = vector.load %arg6[%c0_23, %c72] : memref<128x96xbf16, #tpu.memory_space<vmem>>, vector<128x8xbf16>
    %cst_24 = arith.constant dense<0.000000e+00> : vector<64x128xf32>
    %34 = tpu.matmul %31, %32, %cst_24 {dimension_numbers = #tpu.dot_dimension_numbers<[1], [1], [0], [0], [0, 0, 1, 0], [], []>} : vector<64x8xbf16>, vector<128x8xbf16>, vector<64x128xf32> -> vector<64x128xf32>
    %35 = vector.broadcast %9 : vector<1x128xf32> to vector<64x128xf32>
    %36 = arith.addf %34, %35 : vector<64x128xf32>
    %cst_25 = arith.constant dense<0xFF800000> : vector<64xf32>
    %37 = vector.multi_reduction <maximumf>, %36, %cst_25 [1] : vector<64x128xf32> to vector<64xf32>
    %38 = vector.shape_cast %37 : vector<64xf32> to vector<64x1xf32>
    %39 = vector.broadcast %38 : vector<64x1xf32> to vector<64x128xf32>
    %40 = arith.subf %36, %39 : vector<64x128xf32>
    %41 = math.exp %40 : vector<64x128xf32>
    %cst_26 = arith.constant dense<0.000000e+00> : vector<64xf32>
    %42 = vector.multi_reduction <add>, %41, %cst_26 [1] : vector<64x128xf32> to vector<64xf32>
    %43 = vector.shape_cast %42 : vector<64xf32> to vector<64x1xf32>
    %44 = arith.truncf %41 : vector<64x128xf32> to vector<64x128xbf16>
    %cst_27 = arith.constant dense<0.000000e+00> : vector<64x8xf32>
    %45 = tpu.matmul %44, %33, %cst_27 {dimension_numbers = #tpu.dot_dimension_numbers<[1], [0], [0], [1], [0, 0, 1, 1], [], []>} : vector<64x128xbf16>, vector<128x8xbf16>, vector<64x8xf32> -> vector<64x8xf32>
    %46 = tpu.reciprocal %43 {approx = true} : vector<64x1xf32> -> vector<64x1xf32>
    %47 = vector.broadcast %46 : vector<64x1xf32> to vector<64x8xf32>
    %48 = arith.mulf %45, %47 : vector<64x8xf32>
    %c0_28 = arith.constant 0 : index
    %c0_29 = arith.constant 0 : index
    %c8_30 = arith.constant 8 : index
    %49 = vector.load %arg5[%c0_28, %c0_29, %c8_30] : memref<1x64x32xf32, #tpu.memory_space<vmem>>, vector<1x64x8xf32>
    %50 = vector.shape_cast %49 : vector<1x64x8xf32> to vector<64x8xf32>
    %51 = vector.shape_cast %48 : vector<64x8xf32> to vector<1x64x8xf32>
    tpu.vector_store %arg5[%c0_28, %c0_29, %c8_30], %51 {strides = array<i32>} : memref<1x64x32xf32, #tpu.memory_space<vmem>>, vector<1x64x8xf32>,
    %c0_31 = arith.constant 0 : index
    %c16 = arith.constant 16 : index
    %52 = vector.load %arg6[%c0_31, %c16] : memref<128x96xbf16, #tpu.memory_space<vmem>>, vector<64x8xbf16>
    %c0_32 = arith.constant 0 : index
    %c48 = arith.constant 48 : index
    %53 = vector.load %arg6[%c0_32, %c48] : memref<128x96xbf16, #tpu.memory_space<vmem>>, vector<128x8xbf16>
    %c0_33 = arith.constant 0 : index
    %c80 = arith.constant 80 : index
    %54 = vector.load %arg6[%c0_33, %c80] : memref<128x96xbf16, #tpu.memory_space<vmem>>, vector<128x8xbf16>
    %cst_34 = arith.constant dense<0.000000e+00> : vector<64x128xf32>
    %55 = tpu.matmul %52, %53, %cst_34 {dimension_numbers = #tpu.dot_dimension_numbers<[1], [1], [0], [0], [0, 0, 1, 0], [], []>} : vector<64x8xbf16>, vector<128x8xbf16>, vector<64x128xf32> -> vector<64x128xf32>
    %56 = vector.broadcast %9 : vector<1x128xf32> to vector<64x128xf32>
    %57 = arith.addf %55, %56 : vector<64x128xf32>
    %cst_35 = arith.constant dense<0xFF800000> : vector<64xf32>
    %58 = vector.multi_reduction <maximumf>, %57, %cst_35 [1] : vector<64x128xf32> to vector<64xf32>
    %59 = vector.shape_cast %58 : vector<64xf32> to vector<64x1xf32>
    %60 = vector.broadcast %59 : vector<64x1xf32> to vector<64x128xf32>
    %61 = arith.subf %57, %60 : vector<64x128xf32>
    %62 = math.exp %61 : vector<64x128xf32>
    %cst_36 = arith.constant dense<0.000000e+00> : vector<64xf32>
    %63 = vector.multi_reduction <add>, %62, %cst_36 [1] : vector<64x128xf32> to vector<64xf32>
    %64 = vector.shape_cast %63 : vector<64xf32> to vector<64x1xf32>
    %65 = arith.truncf %62 : vector<64x128xf32> to vector<64x128xbf16>
    %cst_37 = arith.constant dense<0.000000e+00> : vector<64x8xf32>
    %66 = tpu.matmul %65, %54, %cst_37 {dimension_numbers = #tpu.dot_dimension_numbers<[1], [0], [0], [1], [0, 0, 1, 1], [], []>} : vector<64x128xbf16>, vector<128x8xbf16>, vector<64x8xf32> -> vector<64x8xf32>
    %67 = tpu.reciprocal %64 {approx = true} : vector<64x1xf32> -> vector<64x1xf32>
    %68 = vector.broadcast %67 : vector<64x1xf32> to vector<64x8xf32>
    %69 = arith.mulf %66, %68 : vector<64x8xf32>
    %c0_38 = arith.constant 0 : index
    %c0_39 = arith.constant 0 : index
    %c16_40 = arith.constant 16 : index
    %70 = vector.load %arg5[%c0_38, %c0_39, %c16_40] : memref<1x64x32xf32, #tpu.memory_space<vmem>>, vector<1x64x8xf32>
    %71 = vector.shape_cast %70 : vector<1x64x8xf32> to vector<64x8xf32>
    %72 = vector.shape_cast %69 : vector<64x8xf32> to vector<1x64x8xf32>
    tpu.vector_store %arg5[%c0_38, %c0_39, %c16_40], %72 {strides = array<i32>} : memref<1x64x32xf32, #tpu.memory_space<vmem>>, vector<1x64x8xf32>,
    %c0_41 = arith.constant 0 : index
    %c24 = arith.constant 24 : index
    %73 = vector.load %arg6[%c0_41, %c24] : memref<128x96xbf16, #tpu.memory_space<vmem>>, vector<64x8xbf16>
    %c0_42 = arith.constant 0 : index
    %c56 = arith.constant 56 : index
    %74 = vector.load %arg6[%c0_42, %c56] : memref<128x96xbf16, #tpu.memory_space<vmem>>, vector<128x8xbf16>
    %c0_43 = arith.constant 0 : index
    %c88 = arith.constant 88 : index
    %75 = vector.load %arg6[%c0_43, %c88] : memref<128x96xbf16, #tpu.memory_space<vmem>>, vector<128x8xbf16>
    %cst_44 = arith.constant dense<0.000000e+00> : vector<64x128xf32>
    %76 = tpu.matmul %73, %74, %cst_44 {dimension_numbers = #tpu.dot_dimension_numbers<[1], [1], [0], [0], [0, 0, 1, 0], [], []>} : vector<64x8xbf16>, vector<128x8xbf16>, vector<64x128xf32> -> vector<64x128xf32>
    %77 = vector.broadcast %9 : vector<1x128xf32> to vector<64x128xf32>
    %78 = arith.addf %76, %77 : vector<64x128xf32>
    %cst_45 = arith.constant dense<0xFF800000> : vector<64xf32>
    %79 = vector.multi_reduction <maximumf>, %78, %cst_45 [1] : vector<64x128xf32> to vector<64xf32>
    %80 = vector.shape_cast %79 : vector<64xf32> to vector<64x1xf32>
    %81 = vector.broadcast %80 : vector<64x1xf32> to vector<64x128xf32>
    %82 = arith.subf %78, %81 : vector<64x128xf32>
    %83 = math.exp %82 : vector<64x128xf32>
    %cst_46 = arith.constant dense<0.000000e+00> : vector<64xf32>
    %84 = vector.multi_reduction <add>, %83, %cst_46 [1] : vector<64x128xf32> to vector<64xf32>
    %85 = vector.shape_cast %84 : vector<64xf32> to vector<64x1xf32>
    %86 = arith.truncf %83 : vector<64x128xf32> to vector<64x128xbf16>
    %cst_47 = arith.constant dense<0.000000e+00> : vector<64x8xf32>
    %87 = tpu.matmul %86, %75, %cst_47 {dimension_numbers = #tpu.dot_dimension_numbers<[1], [0], [0], [1], [0, 0, 1, 1], [], []>} : vector<64x128xbf16>, vector<128x8xbf16>, vector<64x8xf32> -> vector<64x8xf32>
    %88 = tpu.reciprocal %85 {approx = true} : vector<64x1xf32> -> vector<64x1xf32>
    %89 = vector.broadcast %88 : vector<64x1xf32> to vector<64x8xf32>
    %90 = arith.mulf %87, %89 : vector<64x8xf32>
    %c0_48 = arith.constant 0 : index
    %c0_49 = arith.constant 0 : index
    %c24_50 = arith.constant 24 : index
    %91 = vector.load %arg5[%c0_48, %c0_49, %c24_50] : memref<1x64x32xf32, #tpu.memory_space<vmem>>, vector<1x64x8xf32>
    %92 = vector.shape_cast %91 : vector<1x64x8xf32> to vector<64x8xf32>
    %93 = vector.shape_cast %90 : vector<64x8xf32> to vector<1x64x8xf32>
    tpu.vector_store %arg5[%c0_48, %c0_49, %c24_50], %93 {strides = array<i32>} : memref<1x64x32xf32, #tpu.memory_space<vmem>>, vector<1x64x8xf32>,
    return
  }
  func.func @transform_0(%arg0: i32) -> (i32, i32, i32) {
    %c0_i32 = arith.constant 0 : i32
    %c0_i32_0 = arith.constant 0 : i32
    %c0_i32_1 = arith.constant 0 : i32
    return %arg0, %c0_i32, %c0_i32_0 : i32, i32, i32
  }
  func.func @transform_1(%arg0: i32) -> (i32, i32) {
    %c0_i32 = arith.constant 0 : i32
    %c0_i32_0 = arith.constant 0 : i32
    %c0_i32_1 = arith.constant 0 : i32
    return %c0_i32, %c0_i32_0 : i32, i32
  }
  func.func @transform_2(%arg0: i32) -> (i32, i32) {
    %c0_i32 = arith.constant 0 : i32
    %c0_i32_0 = arith.constant 0 : i32
    %c0_i32_1 = arith.constant 0 : i32
    return %c0_i32, %c0_i32_0 : i32, i32
  }
  func.func @transform_3(%arg0: i32) -> (i32, i32) {
    %c0_i32 = arith.constant 0 : i32
    %c0_i32_0 = arith.constant 0 : i32
    %c0_i32_1 = arith.constant 0 : i32
    return %c0_i32, %c0_i32_0 : i32, i32
  }
  func.func @transform_4(%arg0: i32) -> (i32, i32, i32) {
    %c0_i32 = arith.constant 0 : i32
    %c0_i32_0 = arith.constant 0 : i32
    %c0_i32_1 = arith.constant 0 : i32
    return %arg0, %c0_i32, %c0_i32_0 : i32, i32, i32
  }
}

</mosaic_0001>

<bundles_post_ra>
// kernel: tpu_custom_call.1
= control target key start
LH: loop header
LB: loop body
LE: loop exit
PB: predicated region body
PF: predicated region fallthrough
CT: control target
= control target key end

     0   :  { %9 = vsyncpa [#allocation4], 0  ;;  %s3707_s0 = inlined_call_operand.hbm [shape: bf16[2,128,32], index: 0, kind: input, shape index: {}]   ;;  %s3708_s1 = inlined_call_operand.hbm [shape: bf16[32,96], index: 1, kind: input, shape index: {}]   ;;  %s3709_s2 = inlined_call_operand.hbm [shape: f32[1,96], index: 2, kind: input, shape index: {}]   ;;  %s3710_s3 = inlined_call_operand.hbm [shape: f32[1,128], index: 3, kind: input, shape index: {}]   ;;  %s3711_s4 = inlined_call_operand.hbm [shape: f32[2,64,32], index: 4, kind: output, shape index: {}]  }
   0x1   :  { %11 = vsyncpa [#allocation4 + $0x1], 0 }
   0x2   :  { %12 = vsyncpa [#allocation7], 0 }
   0x3   :  { %13 = vsyncpa [#allocation10], 0 }
   0x4   :  { %14 = vsyncpa [#allocation5], 0 }
   0x5   :  { %16 = vsyncpa [#allocation5 + $0x1], 0  ;;  %s2828_s15 = smov 0   ;;  %s2830_s16 = smov 0  }
   0x6   :  { %s2832_s17 = smov 0   ;;  %s2834_s18 = smov 0  }
   0x7 LB: > { %s2849_s19 = sadd.s32 4294967295, %s2779_s18   ;;  %s1946_s20 = sadd.s32 4294967294, %s2779_s18   ;;  %s2779_s18 = sphi %s2834_s18, %s3734_s18   ;;  %s2775_s17 = sphi %s2832_s17, %s3733_s17   ;;  %s2771_s16 = sphi %s2830_s16, %s3732_s16   ;;  %s2767_s15 = sphi %s2828_s15, %s3731_s15  }
   0x8   : > { %p42_p0 = scmp.ne.s32.totalorder %s2771_s16, %s2767_s15  ;;  %p3712_p1 = scmp.eq.s32.totalorder %s2849_s19, 0 }
   0x9   : > { %p135_p3 = scmp.eq.s32.totalorder %s1946_s20, 1  ;;  %p1947_p5 = scmp.ge.s32.totalorder %s2779_s18, 1 }
   0xa   : > { %p2858_p4 = por %p3712_p1, %p42_p0  ;;  %p142_p7 = scmp.lt.s32.totalorder %s2779_s18, 3 }
   0xb   : > { %p2863_p6 = por %p135_p3, %p42_p0  ;;  %s2781_s24 = smov [#allocation6]  }
   0xc   : > { %s3715_s21 = scalar_select %p2858_p4, 1, 0 }
   0xd   : > { %s3716_s22 = scalar_select %p2863_p6, 1, 0 }
   0xe   : > { %p2868_p8 = pnand %p1947_p5, %p142_p7  ;;  %s154_s25 = sshll.u32 %s2781_s24, 4  ;;  %s2872_s25 = int_to_ptr.vmem [resolvable:$true] %s154_s25 }
   0xf   : > { %s2782_s27 = smov [#allocation8]   ;;  %s2783_s29 = smov [#allocation9]  }
  0x10   : > { %s3717_s23 = scalar_select %p2868_p8, 1, 0 }
  0x11   : > { %p2370_p9 = pneg %p2868_p8  ;;  %s168_s28 = sshll.u32 %s2782_s27, 4  ;;  %s2883_s28 = int_to_ptr.vmem [resolvable:$true] %s168_s28 }
  0x12   : > { %s2885_s30 = sshll.u32 %s2783_s29, 4  ;;  %s2591_s7 = scalar_lea.hbm %s3708_s1, 256  ;;  %s180_s30 = int_to_ptr.vmem [resolvable:$true] %s2885_s30 }
  0x13   : > { %p2879_p11 = pnand %p2370_p9, %p3712_p1  ;;  %p2592_p12 = scmp.ne.s32.totalorder %s3708_s1, %s2591_s7 }
  0x14   : > { %p2598_p5 = scmp.lt.u32.totalorder %s2591_s7, %s3708_s1 }
  0x15   : > { %p2895_p13 = pneg %p2879_p11 }
  0x17   : > { %p2594_p0 = pnand %p2895_p13, %p2592_p12 }
  0x19   : > { %p2595_p3 = pneg %p2594_p0 }
  0x1b   : > { %p2600_p7 = pnand %p2598_p5, %p2595_p3 }
  0x1d   : > { %2603 = shalt.err (!%p2600_p7)
}
  0x1e   : > { %s2604_s13 = scalar_lea.vmem %s2872_s25, 256  ;;  %p2612_p2 = scmp.lt.s32.totalorder %s2872_s25, %s2872_s25 }
  0x1f   : > { %p2605_p9 = scmp.ne.s32.totalorder %s2872_s25, %s2604_s13  ;;  %p2613_p6 = scmp.lt.s32.totalorder %s2604_s13, %s2604_s13 }
  0x21   : > { %p2607_p10 = pnand %p2605_p9, %p2895_p13  ;;  %p2614_p12 = por %p2613_p6, %p2612_p2 }
  0x23   : > { %p2608_p1 = pneg %p2607_p10 }
  0x25   : > { %p2615_p0 = pnand %p2614_p12, %p2608_p1 }
  0x27   : > { %2618 = shalt.err (!%p2615_p0)
}
  0x28   : > { %s2784_s14 = smov 64   ;;  %s2785_s20 = smov 4  }
  0x29   : > { %2373 = dma.hbm_to_vmem [thread:$0]  (!%p2879_p11), %s3708_s1, 256, %s2872_s25, [#allocation7], %s2784_s14, %s2784_s14, %s2785_s20  }
  0x2a   : > { %s2619_s6 = scalar_lea.hbm %s3709_s2, 16 }
  0x2b   : > { %p2620_p1 = scmp.ne.s32.totalorder %s3709_s2, %s2619_s6  ;;  %p2626_p10 = scmp.lt.u32.totalorder %s2619_s6, %s3709_s2 }
  0x2d   : > { %p2622_p2 = pnand %p2620_p1, %p2895_p13 }
  0x2f   : > { %p2623_p6 = pneg %p2622_p2 }
  0x31   : > { %p2628_p3 = pnand %p2626_p10, %p2623_p6 }
  0x33   : > { %2631 = shalt.err (!%p2628_p3)
}
  0x34   : > { %s2632_s25 = scalar_lea.vmem %s2883_s28, 16  ;;  %s2639_s12 = scalar_lea.vmem %s2883_s28, 32 }
  0x35   : > { %p2633_p5 = scmp.ne.s32.totalorder %s2883_s28, %s2632_s25  ;;  %p2640_p12 = scmp.lt.s32.totalorder %s2883_s28, %s2883_s28 }
  0x36   : > { %p2641_p0 = scmp.lt.s32.totalorder %s2639_s12, %s2632_s25 }
  0x37   : > { %p2635_p7 = pnand %p2633_p5, %p2895_p13 }
  0x38   : > { %p2642_p1 = por %p2641_p0, %p2640_p12 }
  0x39   : > { %p2636_p9 = pneg %p2635_p7 }
  0x3b   : > { %p2643_p2 = pnand %p2642_p1, %p2636_p9 }
  0x3d   : > { %2646 = shalt.err (!%p2643_p2)
}
  0x3e   : > { %2376 = dma.hbm_to_vmem [thread:$0]  (!%p2879_p11), %s3709_s2, 16, %s2883_s28, [#allocation7]  }
  0x3f   : > { %s2647_s5 = scalar_lea.hbm %s3710_s3, 16 }
  0x40   : > { %p2648_p6 = scmp.ne.s32.totalorder %s3710_s3, %s2647_s5  ;;  %p2654_p5 = scmp.lt.u32.totalorder %s2647_s5, %s3710_s3 }
  0x42   : > { %p2650_p10 = pnand %p2648_p6, %p2895_p13 }
  0x44   : > { %p2651_p3 = pneg %p2650_p10 }
  0x46   : > { %p2656_p7 = pnand %p2654_p5, %p2651_p3 }
  0x48   : > { %2659 = shalt.err (!%p2656_p7)
}
  0x49   : > { %s2660_s11 = scalar_lea.vmem %s180_s30, 16  ;;  %s2667_s28 = scalar_lea.vmem %s180_s30, 32 }
  0x4a   : > { %p2661_p9 = scmp.ne.s32.totalorder %s180_s30, %s2660_s11  ;;  %p2668_p1 = scmp.lt.s32.totalorder %s180_s30, %s180_s30 }
  0x4b   : > { %p2669_p2 = scmp.lt.s32.totalorder %s2667_s28, %s2660_s11 }
  0x4c   : > { %p2663_p12 = pnand %p2661_p9, %p2895_p13 }
  0x4d   : > { %p2670_p4 = por %p2669_p2, %p2668_p1 }
  0x4e   : > { %p2664_p0 = pneg %p2663_p12 }
  0x50   : > { %p2671_p8 = pnand %p2670_p4, %p2664_p0 }
  0x52   : > { %2674 = shalt.err (!%p2671_p8)
}
  0x53   : > { %2379 = dma.hbm_to_vmem [thread:$0]  (!%p2879_p11), %s3710_s3, 16, %s180_s30, [#allocation10]  }
  0x54   : > { %s2963_s10 = sadd.s32 1, %s2779_s18   ;;  %s29_s26 = sadd.s32 1, %s2775_s17 }
  0x55   : > { %s26_s13 = ssub.s32 %s2779_s18, %s2963_s10  ;;  %p36_p8 = scmp.ne.s32.totalorder %s2775_s17, %s2771_s16 }
  0x56   : > { %p27_p4 = scmp.eq.s32.totalorder %s26_s13, 0  ;;  %p37_p13 = scmp.eq.s32.totalorder %s2779_s18, 0 }
  0x57   : > { %p2391_p6 = scmp.lt.s32.totalorder %s2779_s18, 2  ;;  %p3720_p3 = scmp.eq.s32.totalorder %s2849_s19, 1 }
  0x58   : > { %s2973_s24 = scalar_select %p27_p4, %s2775_s17, %s29_s26  }
  0x59   : > { %p38_p10 = por %p37_p13, %p36_p8  ;;  %p2977_p5 = por %p3720_p3, %p36_p8 }
  0x5a   : > { %s190_s29 = sand.u32 1, %s2775_s17   ;;  %s2002_s5 = sshll.u32 %s2779_s18, 10 }
  0x5b   : > { %s1952_s30 = sshll.u32 %s190_s29, 6  ;;  %s2986_s8 = scalar_lea.hbm %s3707_s0, %s2002_s5 }
  0x5c   : > { %s194_s9 = scalar_lea.vmem [#allocation3], %s1952_s30  ;;  %p2988_p11 = pnand %p2391_p6, %p38_p10 }
  0x5d   : > { %s201_s11 = sshll.u32 %s194_s9, 4  ;;  %s2994_s25 = scalar_lea.sflag [#allocation4], %s190_s29  ;;  %s2992_s11 = int_to_ptr.vmem [resolvable:$true] %s201_s11 }
  0x5e   : > { %s2675_s12 = scalar_lea.hbm %s2986_s8, 1024  ;;  %p2677_p9 = pneg %p2988_p11 }
  0x5f   : > { %p2676_p7 = scmp.ne.s32.totalorder %s2986_s8, %s2675_s12  ;;  %s2680_s5 = scalar_lea.hbm %s3707_s0, 2048 }
  0x60   : > { %p2681_p1 = scmp.lt.u32.totalorder %s2986_s8, %s3707_s0  ;;  %p2682_p2 = scmp.lt.u32.totalorder %s2680_s5, %s2675_s12 }
  0x61   : > { %p2678_p12 = pnand %p2677_p9, %p2676_p7  ;;  %p2684_p8 = scmp.lt.u32.totalorder %s2675_s12, %s2986_s8 }
  0x62   : > { %p2683_p4 = por %p2682_p2, %p2681_p1 }
  0x63   : > { %p2679_p0 = pneg %p2678_p12 }
  0x64   : > { %p2685_p13 = por %p2684_p8, %p2683_p4 }
  0x66   : > { %p2686_p6 = pnand %p2685_p13, %p2679_p0 }
  0x68   : > { %2689 = shalt.err (!%p2686_p6)
}
  0x69   : > { %s2690_s29 = scalar_lea.vmem %s2992_s11, 1024  ;;  %s2786_s7 = smov [#allocation3]  }
  0x6a   : > { %p2691_p10 = scmp.ne.s32.totalorder %s2992_s11, %s2690_s29  ;;  %s2695_s9 = sshll.u32 %s2786_s7, 4  ;;  %s2696_s9 = int_to_ptr.vmem [resolvable:$false] %s2695_s9 }
  0x6b   : > { %s2697_s13 = scalar_lea.vmem %s2696_s9, 2048  ;;  %p2698_p12 = scmp.lt.s32.totalorder %s2992_s11, %s2696_s9 }
  0x6c   : > { %p2693_p3 = pnand %p2691_p10, %p2677_p9  ;;  %p2699_p1 = scmp.lt.s32.totalorder %s2697_s13, %s2690_s29 }
  0x6e   : > { %p2694_p7 = pneg %p2693_p3  ;;  %p2700_p2 = por %p2699_p1, %p2698_p12 }
  0x70   : > { %p2701_p4 = pnand %p2700_p2, %p2694_p7 }
  0x72   : > { %2704 = shalt.err (!%p2701_p4)
}
  0x73   : > { %2383 = dma.hbm_to_vmem [thread:$0]  (!%p2988_p11), %s2986_s8, 1024, %s2992_s11, %s2994_s25, %s2784_s14, %s2784_s14, %s2785_s20  }
  0x74   : > { %p3723_p9 = scmp.ne.s32.totalorder %s3717_s23, 0 }
  0x75   : > { %s3028_s12 = sand.u32 (!%p3723_p9), 1, %s2771_s16   ;;  %p3724_p0 = scmp.ne.s32.totalorder (!%p3723_p9), %s3715_s21, 0 }
  0x76   : > { %213 = sbr.rel (%p3723_p9) target bundleno = 2642 (0xa52), region = 36  ;;  %s1956_s26 = sshll.u32 (!%p3723_p9), %s3028_s12, 6 }
  0x77   : > { %s216_s5 = scalar_lea.sflag (!%p3723_p9), [#allocation4], %s3028_s12  ;;  %s219_s28 = scalar_lea.vmem (!%p3723_p9), [#allocation3], %s1956_s26 }
  0x7d   : > { %2750 = dma.done.wait (%p3724_p0), %s216_s5, 1024  }
  0x7e   : > { %2752 = vsyncadd (%p3724_p0), %s216_s5, 4294966272  ;;  %p3725_p11 = scmp.eq.s32.totalorder %s2849_s19, 0 }
  0x80   : > { %2754 = dma.done.wait (%p3725_p11), [#allocation7], 272   ;;  %p3726_p8 = pmov %p3725_p11 }
  0x82   : > { %2756 = vsyncadd (%p3726_p8), [#allocation7], 4294967024  ;;  %p3727_p13 = pmov %p3726_p8 }
  0x83   : > { %p3728_p6 = pmov %p3726_p8 }
  0x84   : > { %2758 = dma.done.wait (%p3727_p13), [#allocation10], 16  }
  0x85   : > { %2760 = vsyncadd (%p3728_p6), [#allocation10], 4294967280  ;;  %v2448_v0 = vld [vmem:[#allocation6] sm:$0xff]   ;;  %v2449_v1 = vld [vmem:[#allocation6 + $0x8] sm:$0xff]   ;;  %vm336_vm0 = vcmask 261120   ;;  %vm466_vm1 = vcmask 785408  }
  0x86   : > { %2110 = vmatprep.subr.bf16.mxu0 %v2448_v0  ;;  %v2450_v2 = vld [vmem:[%s219_s28] sm:$0xff]   ;;  %v2451_v3 = vld [vmem:[%s219_s28 + $0x8] sm:$0xff]   ;;  %v2452_v4 = vld [vmem:[%s219_s28 + $0x10] sm:$0xff]   ;;  %vm514_vm2 = vcmask 64512   ;;  %s2787_s21 = smov 96   ;;  %s2788_s23 = smov 64  }
  0x87   : > { %2111 = vmatpush3.bf16.msra.mxu0 %v2448_v0  ;;  %2114 = vmatprep.mubr.msk.bf16.mxu0 %vm336_vm0, %v2450_v2  ;;  %v2453_v5 = vld [vmem:[%s219_s28 + $0x18] sm:$0xff]   ;;  %v2454_v6 = vld [vmem:[%s219_s28 + $0x20] sm:$0xff]   ;;  %v2455_v7 = vld [vmem:[%s219_s28 + $0x28] sm:$0xff]   ;;  %s2789_s14 = smov 88   ;;  %s2790_s20 = smov 120   ;;  %vm1127_vm3 = vcmask 130112  }
  0x88   : > { %2112 = vmatprep.subr.bf16.mxu0 %v2449_v1  ;;  %v2456_v8 = vld [vmem:[%s219_s28 + $0x30] sm:$0xff]   ;;  %v2457_v9 = vld [vmem:[%s219_s28 + $0x38] sm:$0xff]   ;;  %s2791_s8 = smov 56   ;;  %s2792_s11 = smov 80   ;;  %vm1474_vm4 = vcmask 195712   ;;  %vm1821_vm5 = vcmask 261312  }
  0x89   : > { %v1961_v11 = vld [vmem:[#allocation8] ss:$0 sm:$0xff]  ;;  %s2793_s25 = smov 112   ;;  %s2794_s30 = smov 48  }
  0x8a   : > { %s2795_s6 = smov 72   ;;  %s2796_s29 = smov 104  }
  0x8b   : > { %2113 = vmatpush3.bf16.msra.mxu0 %v2449_v1  ;;  %s2797_s7 = smov 40   ;;  %s2798_s9 = smov 8  }
  0x8c   : > { %s2799_s13 = smov 16   ;;  %s3555_s5 = scalar_lea.vmem [#allocation11], %s1956_s26 }
  0x8d   : > { %s2800_s26 = smov 24   ;;  %s2003_s28 = sshll.u32 %s2849_s19, 10 }
  0x8e   : > { %2115 = vmatmul.mubr.msk.bf16.vlgmr.msra.gmra.mrb[0].mxu0 %vm336_vm0, %v2451_v3  ;;  %s1831_s19 = scalar_lea.sflag [#allocation5], %s3028_s12 }
  0x8f   : > { %2118 = vmatprep.mubr.msk.bf16.mxu0 %vm336_vm0, %v2452_v4 }
  0x96   : > { %2119 = vmatmul.mubr.msk.bf16.gmra.mrb[4].mxu0 %vm336_vm0, %v2453_v5 }
  0x97   : > { %2122 = vmatprep.mubr.msk.bf16.mxu0 %vm336_vm0, %v2454_v6 }
  0x9e   : > { %2123 = vmatmul.mubr.msk.bf16.gmra.mrb[8].mxu0 %vm336_vm0, %v2455_v7 }
  0x9f   : > { %2126 = vmatprep.mubr.msk.bf16.mxu0 %vm336_vm0, %v2456_v8 }
  0xa6   : > { %2127 = vmatmul.mubr.msk.bf16.gmra.mrb[12].mxu0 %vm336_vm0, %v2457_v9 }
 0x161   : > { %v2116_v10 = vpop.f32.mrb[0].mxu0 }
 0x162   : > { %v395_v12 = vpop.f32.mrb[1].mxu0  ;;  %v404_v14 = vadd.f32 %v2116_v10, %v1961_v11 }
 0x163   : > { %v2117_v13 = vpop.f32.mrb[2].mxu0  ;;  %v396_v17 = vadd.f32 %v1961_v11, %v395_v12 }
 0x164   : > { %v407_v15 = vadd.f32 %v2117_v13, %v1961_v11  ;;  %v398_v16 = vpop.f32.mrb[3].mxu0 }
 0x165   : > { %v399_v18 = vadd.f32 %v1961_v11, %v398_v16 }
 0x166   : > { %v459_v19 = vpack.c.bf16 %v407_v15, %v404_v14 }
 0x167   : > { %v458_v20 = vpack.c.bf16 %v399_v18, %v396_v17 }
 0x168   : > { %468 = vst.msk [vmem:[#allocation2 + $0x8] sm:$0xff] %vm466_vm1, %v459_v19 }
 0x169   : > { %467 = vst.msk [vmem:[#allocation2] sm:$0xff] %vm466_vm1, %v458_v20  ;;  %v2120_v21 = vpop.f32.mrb[4].mxu0 }
 0x16a   : > { %v420_v22 = vadd.f32 %v2120_v21, %v1961_v11  ;;  %v411_v23 = vpop.f32.mrb[5].mxu0 }
 0x16b   : > { %v412_v24 = vadd.f32 %v1961_v11, %v411_v23  ;;  %v2121_v25 = vpop.f32.mrb[6].mxu0 }
 0x16c   : > { %v423_v26 = vadd.f32 %v2121_v25, %v1961_v11  ;;  %v414_v27 = vpop.f32.mrb[7].mxu0 }
 0x16d   : > { %v415_v28 = vadd.f32 %v1961_v11, %v414_v27 }
 0x16e   : > { %v461_v29 = vpack.c.bf16 %v423_v26, %v420_v22  ;;  %v3142_v22 = vld [vmem:[#allocation9] ss:$0 sm:$0xff] }
 0x16f   : > { %v460_v30 = vpack.c.bf16 %v415_v28, %v412_v24  ;;  %v3064_v37 = vld [vmem:[#allocation2 + $0x8] sm:$0xff] }
 0x170   : > { %470 = vst.msk [vmem:[#allocation2 + $0x18] sm:$0xff] %vm466_vm1, %v461_v29  ;;  %v3057_v31 = vld [vmem:[#allocation2] sm:$0xff] }
 0x171   : > { %469 = vst.msk [vmem:[#allocation2 + $0x10] sm:$0xff] %vm466_vm1, %v460_v30  ;;  %498 = vrot.lane.b32.xlu0 %v3057_v31, %s2787_s21  ;;  %2146 = vmatprep.mubr.msk.bf16.mxu1 %vm514_vm2, %v3057_v31  ;;  %v2124_v32 = vpop.f32.mrb[8].mxu0 }
 0x172   : > { %v436_v33 = vadd.f32 %v2124_v32, %v1961_v11  ;;  %v427_v34 = vpop.f32.mrb[9].mxu0 }
 0x173   : > { %v428_v35 = vadd.f32 %v1961_v11, %v427_v34  ;;  %v2125_v36 = vpop.f32.mrb[10].mxu0 }
 0x174   : > { %v439_v38 = vadd.f32 %v2125_v36, %v1961_v11  ;;  %v430_v39 = vpop.f32.mrb[11].mxu0 }
 0x175   : > { %500 = vrot.lane.b32.xlu0 %v3064_v37, %s2787_s21  ;;  %v431_v40 = vadd.f32 %v1961_v11, %v430_v39 }
 0x176   : > { %v463_v41 = vpack.c.bf16 %v439_v38, %v436_v33 }
 0x177   : > { %v462_v42 = vpack.c.bf16 %v431_v40, %v428_v35  ;;  %v3074_v47 = vld [vmem:[#allocation2 + $0x18] sm:$0xff] }
 0x178   : > { %472 = vst.msk [vmem:[#allocation2 + $0x28] sm:$0xff] %vm466_vm1, %v463_v41  ;;  %v3069_v43 = vld [vmem:[#allocation2 + $0x10] sm:$0xff] }
 0x179   : > { %471 = vst.msk [vmem:[#allocation2 + $0x20] sm:$0xff] %vm466_vm1, %v462_v42  ;;  %v2128_v44 = vpop.f32.mrb[12].mxu0  ;;  %502 = vrot.lane.b32.xlu1 %v3069_v43, %s2787_s21 }
 0x17a   : > { %v452_v45 = vadd.f32 %v2128_v44, %v1961_v11  ;;  %v443_v46 = vpop.f32.mrb[13].mxu0 }
 0x17b   : > { %v444_v48 = vadd.f32 %v1961_v11, %v443_v46  ;;  %v2129_v49 = vpop.f32.mrb[14].mxu0 }
 0x17c   : > { %v455_v50 = vadd.f32 %v2129_v49, %v1961_v11  ;;  %v446_v51 = vpop.f32.mrb[15].mxu0 }
 0x17d   : > { %v447_v52 = vadd.f32 %v1961_v11, %v446_v51  ;;  %504 = vrot.lane.b32.xlu1 %v3074_v47, %s2787_s21 }
 0x17e   : > { %v465_v53 = vpack.c.bf16 %v455_v50, %v452_v45 }
 0x17f   : > { %v464_v54 = vpack.c.bf16 %v447_v52, %v444_v48  ;;  %v3078_v55 = vld [vmem:[#allocation2 + $0x28] sm:$0xff] }
 0x180   : > { %474 = vst.msk [vmem:[#allocation2 + $0x38] sm:$0xff] %vm466_vm1, %v465_v53  ;;  %v3081_v56 = vld [vmem:[#allocation2 + $0x20] sm:$0xff] }
 0x181   : > { %473 = vst.msk [vmem:[#allocation2 + $0x30] sm:$0xff] %vm466_vm1, %v464_v54  ;;  %508 = vrot.lane.b32.xlu1 %v3078_v55, %s2787_s21  ;;  %506 = vrot.lane.b32.xlu0 %v3081_v56, %s2787_s21 }
 0x187   : > { %v3088_v57 = vld [vmem:[#allocation2 + $0x38] sm:$0xff] }
 0x188   : > { %512 = vrot.lane.b32.xlu1 %v3088_v57, %s2787_s21  ;;  %v3092_v58 = vld [vmem:[#allocation2 + $0x30] sm:$0xff] }
 0x189   : > { %510 = vrot.lane.b32.xlu0 %v3092_v58, %s2787_s21  ;;  %s1844_s21 = sshll.u32 %s3555_s5, 4  ;;  %s3660_s21 = int_to_ptr.vmem [resolvable:$true] %s1844_s21 }
 0x18c   : > { %678 = vrot.lane.b32.xlu1 %v3064_v37, %s2788_s23 }
 0x18d   : > { %676 = vrot.lane.b32.xlu0 %v3057_v31, %s2788_s23 }
 0x190   : > { %680 = vrot.lane.b32.xlu1 %v3069_v43, %s2788_s23 }
 0x191   : > { %682 = vrot.lane.b32.xlu0 %v3074_v47, %s2788_s23 }
 0x194   : > { %684 = vrot.lane.b32.xlu1 %v3081_v56, %s2788_s23 }
 0x195   : > { %813 = vrot.lane.b32.xlu0 %v3057_v31, %s2789_s14 }
 0x198   : > { %686 = vrot.lane.b32.xlu1 %v3078_v55, %s2788_s23 }
 0x199   : > { %817 = vrot.lane.b32.xlu0 %v3069_v43, %s2789_s14 }
 0x19c   : > { %690 = vrot.lane.b32.xlu1 %v3088_v57, %s2788_s23 }
 0x19d   : > { %819 = vrot.lane.b32.xlu0 %v3074_v47, %s2789_s14 }
 0x1a0   : > { %815 = vrot.lane.b32.xlu1 %v3064_v37, %s2789_s14 }
 0x1a1   : > { %688 = vrot.lane.b32.xlu0 %v3092_v58, %s2788_s23 }
 0x1e3   : > { %v499_v59 = vpop.permute.xlu0 %498 }
 0x1e4   : > { %2322 = vmatprep.subr.msk.bf16.mxu1 %vm514_vm2, %v499_v59  ;;  %v528_v60 = vsel %vm514_vm2, %v499_v59, 0 }
 0x1e5   : > { %2131 = vmatpush3.bf16.xpose.msra.mxu1 %v528_v60 }
 0x1e7   : > { %v501_v61 = vpop.permute.xlu0 %500 }
 0x1e8   : > { %2323 = vmatprep.subr.msk.bf16.mxu1 %vm514_vm2, %v501_v61  ;;  %v531_v63 = vsel %vm514_vm2, %v501_v61, 0 }
 0x1eb   : > { %v503_v62 = vpop.permute.xlu1 %502 }
 0x1ec   : > { %v534_v1 = vsel %vm514_vm2, %v503_v62, 0 }
 0x1ed   : > { %2133 = vmatpush3.bf16.xpose.msra.mxu1 %v531_v63 }
 0x1ee   : > { %2324 = vmatprep.subr.msk.bf16.mxu1 %vm514_vm2, %v503_v62 }
 0x1ef   : > { %v505_v0 = vpop.permute.xlu1 %504 }
 0x1f0   : > { %v537_v6 = vsel %vm514_vm2, %v505_v0, 0 }
 0x1f3   : > { %v509_v2 = vpop.permute.xlu1 %508  ;;  %v507_v3 = vpop.permute.xlu0 %506 }
 0x1f4   : > { %v540_v10 = vsel %vm514_vm2, %v507_v3, 0  ;;  %v543_v15 = vsel %vm514_vm2, %v509_v2, 0 }
 0x1f5   : > { %2135 = vmatpush3.bf16.xpose.msra.mxu1 %v534_v1 }
 0x1f6   : > { %2325 = vmatprep.subr.msk.bf16.mxu1 %vm514_vm2, %v505_v0 }
 0x1fa   : > { %v513_v4 = vpop.permute.xlu1 %512 }
 0x1fb   : > { %v511_v5 = vpop.permute.xlu0 %510  ;;  %v549_v21 = vsel %vm514_vm2, %v513_v4, 0 }
 0x1fc   : > { %v546_v18 = vsel %vm514_vm2, %v511_v5, 0 }
 0x1fd   : > { %2137 = vmatpush3.bf16.xpose.msra.mxu1 %v537_v6 }
 0x1fe   : > { %2326 = vmatprep.subr.msk.bf16.mxu1 %vm514_vm2, %v507_v3  ;;  %v679_v7 = vpop.permute.xlu1 %678 }
 0x1ff   : > { %v677_v8 = vpop.permute.xlu0 %676 }
 0x200   : > { %2154 = vmatprep.subr.bf16.mxu0 %v677_v8 }
 0x201   : > { %2155 = vmatpush3.bf16.msra.mxu0 %v677_v8 }
 0x202   : > { %2156 = vmatprep.subr.bf16.mxu0 %v679_v7  ;;  %v681_v11 = vpop.permute.xlu1 %680 }
 0x203   : > { %v683_v9 = vpop.permute.xlu0 %682 }
 0x205   : > { %2139 = vmatpush3.bf16.xpose.msra.mxu1 %v540_v10  ;;  %2157 = vmatpush3.bf16.msra.mxu0 %v679_v7 }
 0x206   : > { %2327 = vmatprep.subr.msk.bf16.mxu1 %vm514_vm2, %v509_v2  ;;  %2158 = vmatprep.subr.bf16.mxu0 %v681_v11  ;;  %v685_v13 = vpop.permute.xlu1 %684 }
 0x207   : > { %v3123_v12 = vpop.permute.xlu0 %813 }
 0x208   : > { %v842_v2 = vsel %vm514_vm2, %v3123_v12, 0 }
 0x209   : > { %2159 = vmatpush3.bf16.msra.mxu0 %v681_v11 }
 0x20a   : > { %2160 = vmatprep.subr.bf16.mxu0 %v683_v9  ;;  %v687_v17 = vpop.permute.xlu1 %686 }
 0x20b   : > { %v3125_v14 = vpop.permute.xlu0 %817 }
 0x20d   : > { %2141 = vmatpush3.bf16.xpose.msra.mxu1 %v543_v15  ;;  %2161 = vmatpush3.bf16.msra.mxu0 %v683_v9 }
 0x20e   : > { %2162 = vmatprep.subr.bf16.mxu0 %v685_v13  ;;  %2328 = vmatprep.subr.msk.bf16.mxu1 %vm514_vm2, %v511_v5  ;;  %v691_v20 = vpop.permute.xlu1 %690 }
 0x20f   : > { %v3129_v16 = vpop.permute.xlu0 %819 }
 0x210   : > { %v851_v5 = vsel %vm514_vm2, %v3129_v16, 0 }
 0x211   : > { %2163 = vmatpush3.bf16.msra.mxu0 %v685_v13 }
 0x212   : > { %2164 = vmatprep.subr.bf16.mxu0 %v687_v17  ;;  %v816_v41 = vpop.permute.xlu1 %815 }
 0x213   : > { %v689_v19 = vpop.permute.xlu0 %688  ;;  %v845_v3 = vsel %vm514_vm2, %v816_v41, 0 }
 0x215   : > { %2143 = vmatpush3.bf16.xpose.msra.mxu1 %v546_v18  ;;  %2165 = vmatpush3.bf16.msra.mxu0 %v687_v17 }
 0x216   : > { %2329 = vmatprep.subr.msk.bf16.mxu1 %vm514_vm2, %v513_v4  ;;  %2166 = vmatprep.subr.bf16.mxu0 %v689_v19  ;;  %v848_v4 = vsel %vm514_vm2, %v3125_v14, 0 }
 0x219   : > { %2167 = vmatpush3.bf16.msra.mxu0 %v689_v19 }
 0x21a   : > { %2168 = vmatprep.subr.bf16.mxu0 %v691_v20 }
 0x21d   : > { %2145 = vmatpush3.bf16.xpose.msra.mxu1 %v549_v21  ;;  %2169 = vmatpush3.bf16.msra.mxu0 %v691_v20 }
 0x21e   : > { %2330 = vmatprep.subr.msk.bf16.mxu0 %vm514_vm2, %v3123_v12 }
 0x224   : > { %2147 = vmatmul.mubr.msk.bf16.vlgmr.msra.gmra.mrb[0].mxu1 %vm514_vm2, %v3064_v37 }
 0x225   : > { %2150 = vmatprep.mubr.msk.bf16.mxu1 %vm514_vm2, %v3069_v43 }
 0x22c   : > { %2151 = vmatmul.mubr.msk.bf16.gmra.mrb[4].mxu1 %vm514_vm2, %v3074_v47 }
 0x2f7   : > { %v2148_v23 = vpop.f32.mrb[0].mxu1 }
 0x2f8   : > { %v594_v24 = vadd.f32 %v2148_v23, %v3142_v22  ;;  %v585_v25 = vpop.f32.mrb[1].mxu1 }
 0x2f9   : > { %v2149_v26 = vpop.f32.mrb[2].mxu1  ;;  %v586_v29 = vadd.f32 %v3142_v22, %v585_v25 }
 0x2fa   : > { %620 = vmax.xlane.f32.xlu0 %v594_v24  ;;  %v588_v27 = vpop.f32.mrb[3].mxu1  ;;  %v597_v32 = vadd.f32 %v2149_v26, %v3142_v22 }
 0x2fb   : > { %v589_v28 = vadd.f32 %v3142_v22, %v588_v27 }
 0x2fd   : > { %618 = vmax.xlane.f32.xlu1 %v589_v28 }
 0x2fe   : > { %616 = vmax.xlane.f32.xlu0 %v586_v29 }
 0x2ff   : > { %v2152_v30 = vpop.f32.mrb[4].mxu1 }
 0x300   : > { %v601_v33 = vpop.f32.mrb[5].mxu1  ;;  %v3153_v36 = vadd.f32 %v2152_v30, %v3142_v22 }
 0x301   : > { %v2153_v34 = vpop.f32.mrb[6].mxu1  ;;  %v3157_v38 = vadd.f32 %v3142_v22, %v601_v33 }
 0x302   : > { %v604_v35 = vpop.f32.mrb[7].mxu1  ;;  %622 = vmax.xlane.f32.xlu0 %v597_v32  ;;  %v3165_v40 = vadd.f32 %v2153_v34, %v3142_v22 }
 0x303   : > { %v3160_v39 = vadd.f32 %v3142_v22, %v604_v35 }
 0x30e   : > { %821 = vrot.lane.b32.xlu1 %v3081_v56, %s2789_s14 }
 0x318   : > { %823 = vrot.lane.b32.xlu0 %v3078_v55, %s2789_s14 }
 0x332   : > { %628 = vmax.xlane.f32.xlu1 %v3153_v36 }
 0x336   : > { %624 = vmax.xlane.f32.xlu1 %v3157_v38 }
 0x337   : > { %626 = vmax.xlane.f32.xlu0 %v3160_v39 }
 0x33a   : > { %630 = vmax.xlane.f32.xlu1 %v3165_v40 }
 0x34b   : > { %827 = vrot.lane.b32.xlu1 %v3088_v57, %s2789_s14 }
 0x34d   : > { %825 = vrot.lane.b32.xlu0 %v3092_v58, %s2789_s14 }
 0x34f   : > { %803 = vrot.lane.b32.xlu1 %v3064_v37, %s2790_s20 }
 0x351   : > { %801 = vrot.lane.b32.xlu0 %v3057_v31, %s2790_s20 }
 0x353   : > { %807 = vrot.lane.b32.xlu1 %v3074_v47, %s2790_s20 }
 0x355   : > { %805 = vrot.lane.b32.xlu0 %v3069_v43, %s2790_s20  ;;  %s3656_s20 = scalar_lea.hbm %s3711_s4, %s2003_s28 }
 0x357   : > { %992 = vrot.lane.b32.xlu1 %v3064_v37, %s2791_s8 }
 0x359   : > { %990 = vrot.lane.b32.xlu0 %v3057_v31, %s2791_s8 }
 0x35b   : > { %994 = vrot.lane.b32.xlu1 %v3069_v43, %s2791_s8 }
 0x35d   : > { %996 = vrot.lane.b32.xlu0 %v3074_v47, %s2791_s8 }
 0x35f   : > { %998 = vrot.lane.b32.xlu1 %v3081_v56, %s2791_s8 }
 0x361   : > { %1002 = vrot.lane.b32.xlu0 %v3092_v58, %s2791_s8 }
 0x363   : > { %1000 = vrot.lane.b32.xlu1 %v3078_v55, %s2791_s8 }
 0x365   : > { %1160 = vrot.lane.b32.xlu0 %v3057_v31, %s2792_s11 }
 0x367   : > { %1004 = vrot.lane.b32.xlu1 %v3088_v57, %s2791_s8  ;;  %s2705_s8 = scalar_lea.vmem %s3660_s21, 1024 }
 0x368   : > { %p2706_p10 = scmp.ne.s32.totalorder %s3660_s21, %s2705_s8 }
 0x369   : > { %1164 = vrot.lane.b32.xlu0 %v3069_v43, %s2792_s11 }
 0x36a   : > { %p2707_p3 = pnand %p2706_p10, %p2977_p5 }
 0x36b   : > { %1162 = vrot.lane.b32.xlu1 %v3064_v37, %s2792_s11 }
 0x36c   : > { %p2708_p7 = pneg %p2707_p3 }
 0x36d   : > { %1166 = vrot.lane.b32.xlu0 %v3074_v47, %s2792_s11 }
 0x387   : > { %v621_v42 = vpop.xlane.xlu0 %620 }
 0x388   : > { %v634_v45 = vsub.f32 %v594_v24, %v621_v42 }
 0x38a   : > { %v619_v44 = vpop.xlane.xlu1 %618  ;;  %v644_v52 = vmul.f32 1.442695, %v634_v45 }
 0x38b   : > { %v633_v46 = vsub.f32 %v589_v28, %v619_v44  ;;  %v617_v48 = vpop.xlane.xlu0 %616 }
 0x38c   : > { %v632_v49 = vsub.f32 %v586_v29, %v617_v48 }
 0x38d   : > { %v642_v50 = vmul.f32 1.442695, %v633_v46 }
 0x38e   : > { %v640_v51 = vmul.f32 1.442695, %v632_v49  ;;  %v822_v6 = vpop.permute.xlu1 %821 }
 0x38f   : > { %2458 = vpow2.f32 %v642_v50  ;;  %v623_v53 = vpop.xlane.xlu0 %622  ;;  %v854_v9 = vsel %vm514_vm2, %v822_v6, 0 }
 0x390   : > { %2460 = vpow2.f32 %v640_v51  ;;  %v635_v54 = vsub.f32 %v597_v32, %v623_v53 }
 0x391   : > { %2462 = vpow2.f32 %v644_v52 }
 0x392   : > { %v646_v59 = vmul.f32 1.442695, %v635_v54 }
 0x393   : > { %v824_v8 = vpop.permute.xlu0 %823 }
 0x394   : > { %2464 = vpow2.f32 %v646_v59  ;;  %v857_v21 = vsel %vm514_vm2, %v824_v8, 0 }
 0x399   : > { %v3192_v60 = vpop.eup %2458 }
 0x39a   : > { %v3194_v61 = vpop.eup %2460 }
 0x39b   : > { %v672_v62 = vpack.c.bf16 %v3192_v60, %v3194_v61  ;;  %v3198_v63 = vpop.eup %2462 }
 0x39d   : > { %2170 = vmatprep.mubr.bf16.mxu0 %v672_v62 }
 0x39e   : > { %v3200_v0 = vpop.eup %2464 }
 0x39f   : > { %v673_v1 = vpack.c.bf16 %v3200_v0, %v3198_v63 }
 0x3a1   : > { %2171 = vmatmul.mubr.bf16.vlgmr.msra.gmra.mrb[16].mxu0 %v673_v1 }
 0x3a2   : > { %2179 = vmatpush3.bf16.xpose.msra.mxu0 %v842_v2 }
 0x3a3   : > { %2331 = vmatprep.subr.msk.bf16.mxu0 %vm514_vm2, %v816_v41 }
 0x3aa   : > { %2181 = vmatpush3.bf16.xpose.msra.mxu0 %v845_v3 }
 0x3ab   : > { %2332 = vmatprep.subr.msk.bf16.mxu0 %vm514_vm2, %v3125_v14 }
 0x3b2   : > { %2183 = vmatpush3.bf16.xpose.msra.mxu0 %v848_v4 }
 0x3b3   : > { %2333 = vmatprep.subr.msk.bf16.mxu0 %vm514_vm2, %v3129_v16 }
 0x3ba   : > { %2185 = vmatpush3.bf16.xpose.msra.mxu0 %v851_v5 }
 0x3bb   : > { %2334 = vmatprep.subr.msk.bf16.mxu0 %vm514_vm2, %v822_v6 }
 0x3bf   : > { %v629_v7 = vpop.xlane.xlu1 %628 }
 0x3c0   : > { %v638_v10 = vsub.f32 %v3153_v36, %v629_v7 }
 0x3c2   : > { %2187 = vmatpush3.bf16.xpose.msra.mxu0 %v854_v9  ;;  %v652_v16 = vmul.f32 1.442695, %v638_v10 }
 0x3c3   : > { %2335 = vmatprep.subr.msk.bf16.mxu0 %vm514_vm2, %v824_v8  ;;  %v625_v11 = vpop.xlane.xlu1 %624 }
 0x3c4   : > { %v636_v12 = vsub.f32 %v3157_v38, %v625_v11  ;;  %v627_v13 = vpop.xlane.xlu0 %626 }
 0x3c5   : > { %v637_v14 = vsub.f32 %v3160_v39, %v627_v13 }
 0x3c6   : > { %v648_v15 = vmul.f32 1.442695, %v636_v12 }
 0x3c7   : > { %v650_v17 = vmul.f32 1.442695, %v637_v14  ;;  %v631_v18 = vpop.xlane.xlu1 %630 }
 0x3c8   : > { %2466 = vpow2.f32 %v648_v15  ;;  %v639_v19 = vsub.f32 %v3165_v40, %v631_v18  ;;  %v826_v20 = vpop.permute.xlu0 %825 }
 0x3c9   : > { %2468 = vpow2.f32 %v650_v17  ;;  %v860_v28 = vsel %vm514_vm2, %v826_v20, 0 }
 0x3ca   : > { %v654_v23 = vmul.f32 1.442695, %v639_v19  ;;  %2189 = vmatpush3.bf16.xpose.msra.mxu0 %v857_v21  ;;  %2470 = vpow2.f32 %v652_v16 }
 0x3cb   : > { %2336 = vmatprep.subr.msk.bf16.mxu0 %vm514_vm2, %v826_v20  ;;  %v828_v24 = vpop.permute.xlu1 %827 }
 0x3cc   : > { %2472 = vpow2.f32 %v654_v23  ;;  %v802_v25 = vpop.permute.xlu0 %801  ;;  %v863_v40 = vsel %vm514_vm2, %v828_v24, 0 }
 0x3cf   : > { %v804_v26 = vpop.permute.xlu1 %803 }
 0x3d0   : > { %v806_v27 = vpop.permute.xlu0 %805 }
 0x3d2   : > { %v3226_v29 = vpop.eup %2466  ;;  %2191 = vmatpush3.bf16.xpose.msra.mxu0 %v860_v28 }
 0x3d3   : > { %v3228_v30 = vpop.eup %2468  ;;  %2337 = vmatprep.subr.msk.bf16.mxu0 %vm514_vm2, %v828_v24  ;;  %v808_v32 = vpop.permute.xlu1 %807 }
 0x3d4   : > { %v991_v33 = vpop.permute.xlu0 %990  ;;  %v674_v34 = vpack.c.bf16 %v3228_v30, %v3226_v29  ;;  %v3233_v35 = vpop.eup %2470 }
 0x3d5   : > { %2202 = vmatprep.subr.bf16.mxu1 %v991_v33 }
 0x3d6   : > { %v3235_v36 = vpop.eup %2472  ;;  %2174 = vmatprep.mubr.bf16.mxu0 %v674_v34  ;;  %2203 = vmatpush3.bf16.msra.mxu1 %v991_v33 }
 0x3d7   : > { %v993_v38 = vpop.permute.xlu1 %992  ;;  %v675_v39 = vpack.c.bf16 %v3235_v36, %v3233_v35 }
 0x3d8   : > { %2204 = vmatprep.subr.bf16.mxu1 %v993_v38  ;;  %v997_v42 = vpop.permute.xlu0 %996 }
 0x3d9   : > { %2175 = vmatmul.mubr.bf16.gmra.mrb[20].mxu0 %v675_v39 }
 0x3da   : > { %2193 = vmatpush3.bf16.xpose.msra.mxu0 %v863_v40  ;;  %2194 = vmatprep.mubr.msk.bf16.mxu0 %vm514_vm2, %v802_v25 }
 0x3db   : > { %2205 = vmatpush3.bf16.msra.mxu1 %v993_v38  ;;  %v995_v41 = vpop.permute.xlu1 %994 }
 0x3dc   : > { %2206 = vmatprep.subr.bf16.mxu1 %v995_v41  ;;  %v1003_v46 = vpop.permute.xlu0 %1002 }
 0x3df   : > { %2207 = vmatpush3.bf16.msra.mxu1 %v995_v41  ;;  %v999_v44 = vpop.permute.xlu1 %998 }
 0x3e0   : > { %2208 = vmatprep.subr.bf16.mxu1 %v997_v42  ;;  %v3244_v49 = vpop.permute.xlu0 %1160 }
 0x3e1   : > { %2195 = vmatmul.mubr.msk.bf16.vlgmr.msra.gmra.mrb[24].mxu0 %vm514_vm2, %v804_v26 }
 0x3e2   : > { %2198 = vmatprep.mubr.msk.bf16.mxu0 %vm514_vm2, %v806_v27 }
 0x3e3   : > { %2209 = vmatpush3.bf16.msra.mxu1 %v997_v42  ;;  %v1001_v45 = vpop.permute.xlu1 %1000 }
 0x3e4   : > { %2210 = vmatprep.subr.bf16.mxu1 %v999_v44  ;;  %v1165_v18 = vpop.permute.xlu0 %1164 }
 0x3e7   : > { %2211 = vmatpush3.bf16.msra.mxu1 %v999_v44  ;;  %v1005_v48 = vpop.permute.xlu1 %1004 }
 0x3e8   : > { %2212 = vmatprep.subr.bf16.mxu1 %v1001_v45  ;;  %v1167_v19 = vpop.permute.xlu0 %1166 }
 0x3e9   : > { %2199 = vmatmul.mubr.msk.bf16.gmra.mrb[28].mxu0 %vm514_vm2, %v808_v32 }
 0x3eb   : > { %2213 = vmatpush3.bf16.msra.mxu1 %v1001_v45  ;;  %v1163_v20 = vpop.permute.xlu1 %1162 }
 0x3ec   : > { %2214 = vmatprep.subr.bf16.mxu1 %v1003_v46 }
 0x3ef   : > { %2215 = vmatpush3.bf16.msra.mxu1 %v1003_v46 }
 0x3f0   : > { %2216 = vmatprep.subr.bf16.mxu1 %v1005_v48 }
 0x3f3   : > { %2217 = vmatpush3.bf16.msra.mxu1 %v1005_v48  ;;  %v1189_v48 = vsel %vm514_vm2, %v3244_v49, 0 }
 0x3f4   : > { %2338 = vmatprep.subr.msk.bf16.mxu1 %vm514_vm2, %v3244_v49 }
 0x474   : > { %v3248_v50 = vpop.f32.mrb[16].mxu0 }
 0x475   : > { %v3250_v51 = vpop.f32.mrb[17].mxu0 }
 0x476   : > { %v3252_v52 = vpop.f32.mrb[18].mxu0 }
 0x477   : > { %v3254_v53 = vpop.f32.mrb[19].mxu0 }
 0x4ac   : > { %v3256_v54 = vpop.f32.mrb[20].mxu0 }
 0x4ad   : > { %v3258_v59 = vpop.f32.mrb[21].mxu0 }
 0x4ae   : > { %v3260_v62 = vpop.f32.mrb[22].mxu0 }
 0x4af   : > { %v3262_v1 = vpop.f32.mrb[23].mxu0 }
 0x4b4   : > { %v2196_v2 = vpop.f32.mrb[24].mxu0 }
 0x4b5   : > { %v908_v3 = vadd.f32 %v2196_v2, %v3142_v22  ;;  %v899_v4 = vpop.f32.mrb[25].mxu0  ;;  %v1192_v2 = vsel %vm514_vm2, %v1163_v20, 0 }
 0x4b6   : > { %v2197_v5 = vpop.f32.mrb[26].mxu0  ;;  %v900_v8 = vadd.f32 %v3142_v22, %v899_v4  ;;  %v1198_v4 = vsel %vm514_vm2, %v1167_v19, 0 }
 0x4b7   : > { %934 = vmax.xlane.f32.xlu0 %v908_v3  ;;  %v902_v6 = vpop.f32.mrb[27].mxu0  ;;  %v911_v10 = vadd.f32 %v2197_v5, %v3142_v22 }
 0x4b8   : > { %v903_v7 = vadd.f32 %v3142_v22, %v902_v6 }
 0x4ba   : > { %932 = vmax.xlane.f32.xlu1 %v903_v7 }
 0x4bb   : > { %930 = vmax.xlane.f32.xlu0 %v900_v8 }
 0x4bc   : > { %v2200_v9 = vpop.f32.mrb[28].mxu0 }
 0x4bd   : > { %v915_v11 = vpop.f32.mrb[29].mxu0  ;;  %v3273_v14 = vadd.f32 %v2200_v9, %v3142_v22 }
 0x4be   : > { %v2201_v12 = vpop.f32.mrb[30].mxu0  ;;  %v3277_v15 = vadd.f32 %v3142_v22, %v915_v11 }
 0x4bf   : > { %936 = vmax.xlane.f32.xlu0 %v911_v10  ;;  %v918_v13 = vpop.f32.mrb[31].mxu0  ;;  %v3285_v17 = vadd.f32 %v2201_v12, %v3142_v22 }
 0x4c0   : > { %v3280_v16 = vadd.f32 %v3142_v22, %v918_v13 }
 0x4cb   : > { %1168 = vrot.lane.b32.xlu1 %v3081_v56, %s2792_s11 }
 0x4d5   : > { %1170 = vrot.lane.b32.xlu0 %v3078_v55, %s2792_s11 }
 0x4ef   : > { %942 = vmax.xlane.f32.xlu1 %v3273_v14 }
 0x4f3   : > { %938 = vmax.xlane.f32.xlu1 %v3277_v15 }
 0x4f4   : > { %940 = vmax.xlane.f32.xlu0 %v3280_v16 }
 0x4f7   : > { %944 = vmax.xlane.f32.xlu1 %v3285_v17 }
 0x508   : > { %1174 = vrot.lane.b32.xlu1 %v3088_v57, %s2792_s11 }
 0x50a   : > { %1172 = vrot.lane.b32.xlu0 %v3092_v58, %s2792_s11  ;;  %s2801_s11 = smov [#allocation11]  }
 0x50c   : > { %1150 = vrot.lane.b32.xlu1 %v3064_v37, %s2793_s25 }
 0x50e   : > { %1148 = vrot.lane.b32.xlu0 %v3057_v31, %s2793_s25 }
 0x510   : > { %1154 = vrot.lane.b32.xlu1 %v3074_v47, %s2793_s25 }
 0x512   : > { %1152 = vrot.lane.b32.xlu0 %v3069_v43, %s2793_s25  ;;  %s2709_s25 = sshll.u32 %s2801_s11, 4  ;;  %s2710_s25 = int_to_ptr.vmem [resolvable:$false] %s2709_s25 }
 0x513   : > { %p2712_p12 = scmp.lt.s32.totalorder %s3660_s21, %s2710_s25 }
 0x514   : > { %1339 = vrot.lane.b32.xlu1 %v3064_v37, %s2794_s30 }
 0x516   : > { %1337 = vrot.lane.b32.xlu0 %v3057_v31, %s2794_s30 }
 0x518   : > { %1341 = vrot.lane.b32.xlu1 %v3069_v43, %s2794_s30 }
 0x51a   : > { %1343 = vrot.lane.b32.xlu0 %v3074_v47, %s2794_s30 }
 0x51c   : > { %1345 = vrot.lane.b32.xlu1 %v3081_v56, %s2794_s30 }
 0x51e   : > { %1349 = vrot.lane.b32.xlu0 %v3092_v58, %s2794_s30 }
 0x520   : > { %1347 = vrot.lane.b32.xlu1 %v3078_v55, %s2794_s30 }
 0x522   : > { %1507 = vrot.lane.b32.xlu0 %v3057_v31, %s2795_s6 }
 0x524   : > { %1351 = vrot.lane.b32.xlu1 %v3088_v57, %s2794_s30  ;;  %s2711_s30 = scalar_lea.vmem %s2710_s25, 2048 }
 0x525   : > { %p2713_p1 = scmp.lt.s32.totalorder %s2711_s30, %s2705_s8 }
 0x526   : > { %1511 = vrot.lane.b32.xlu0 %v3069_v43, %s2795_s6 }
 0x527   : > { %p2714_p2 = por %p2713_p1, %p2712_p12 }
 0x528   : > { %1509 = vrot.lane.b32.xlu1 %v3064_v37, %s2795_s6 }
 0x529   : > { %p2715_p4 = pnand %p2714_p2, %p2708_p7 }
 0x52a   : > { %1513 = vrot.lane.b32.xlu0 %v3074_v47, %s2795_s6 }
 0x544   : > { %v935_v21 = vpop.xlane.xlu0 %934 }
 0x545   : > { %v948_v24 = vsub.f32 %v908_v3, %v935_v21  ;;  %v1195_v3 = vsel %vm514_vm2, %v1165_v18, 0 }
 0x547   : > { %v933_v23 = vpop.xlane.xlu1 %932  ;;  %v958_v33 = vmul.f32 1.442695, %v948_v24 }
 0x548   : > { %v947_v25 = vsub.f32 %v903_v7, %v933_v23  ;;  %v931_v26 = vpop.xlane.xlu0 %930 }
 0x549   : > { %v946_v27 = vsub.f32 %v900_v8, %v931_v26 }
 0x54a   : > { %v956_v28 = vmul.f32 1.442695, %v947_v25 }
 0x54b   : > { %v954_v32 = vmul.f32 1.442695, %v946_v27  ;;  %v1169_v5 = vpop.permute.xlu1 %1168 }
 0x54c   : > { %2474 = vpow2.f32 %v956_v28  ;;  %v937_v34 = vpop.xlane.xlu0 %936  ;;  %v1201_v7 = vsel %vm514_vm2, %v1169_v5, 0 }
 0x54d   : > { %2476 = vpow2.f32 %v954_v32  ;;  %v949_v38 = vsub.f32 %v911_v10, %v937_v34 }
 0x54e   : > { %2478 = vpow2.f32 %v958_v33 }
 0x54f   : > { %v960_v39 = vmul.f32 1.442695, %v949_v38 }
 0x550   : > { %v1171_v6 = vpop.permute.xlu0 %1170 }
 0x551   : > { %2480 = vpow2.f32 %v960_v39  ;;  %v1204_v24 = vsel %vm514_vm2, %v1171_v6, 0 }
 0x556   : > { %v3312_v40 = vpop.eup %2474 }
 0x557   : > { %v3314_v41 = vpop.eup %2476 }
 0x558   : > { %v986_v42 = vpack.c.bf16 %v3312_v40, %v3314_v41  ;;  %v3318_v44 = vpop.eup %2478 }
 0x55a   : > { %2218 = vmatprep.mubr.bf16.mxu1 %v986_v42 }
 0x55b   : > { %v3320_v45 = vpop.eup %2480 }
 0x55c   : > { %v987_v46 = vpack.c.bf16 %v3320_v45, %v3318_v44 }
 0x55e   : > { %2219 = vmatmul.mubr.bf16.vlgmr.msra.gmra.mrb[8].mxu1 %v987_v46 }
 0x55f   : > { %2227 = vmatpush3.bf16.xpose.msra.mxu1 %v1189_v48 }
 0x560   : > { %2339 = vmatprep.subr.msk.bf16.mxu1 %vm514_vm2, %v1163_v20 }
 0x567   : > { %2229 = vmatpush3.bf16.xpose.msra.mxu1 %v1192_v2 }
 0x568   : > { %2340 = vmatprep.subr.msk.bf16.mxu1 %vm514_vm2, %v1165_v18 }
 0x56f   : > { %2231 = vmatpush3.bf16.xpose.msra.mxu1 %v1195_v3 }
 0x570   : > { %2341 = vmatprep.subr.msk.bf16.mxu1 %vm514_vm2, %v1167_v19 }
 0x577   : > { %2233 = vmatpush3.bf16.xpose.msra.mxu1 %v1198_v4 }
 0x578   : > { %2342 = vmatprep.subr.msk.bf16.mxu1 %vm514_vm2, %v1169_v5 }
 0x57c   : > { %v943_v49 = vpop.xlane.xlu1 %942 }
 0x57d   : > { %v952_v8 = vsub.f32 %v3273_v14, %v943_v49 }
 0x57f   : > { %2235 = vmatpush3.bf16.xpose.msra.mxu1 %v1201_v7  ;;  %v966_v18 = vmul.f32 1.442695, %v952_v8 }
 0x580   : > { %2343 = vmatprep.subr.msk.bf16.mxu1 %vm514_vm2, %v1171_v6  ;;  %v939_v9 = vpop.xlane.xlu1 %938 }
 0x581   : > { %v950_v10 = vsub.f32 %v3277_v15, %v939_v9  ;;  %v941_v11 = vpop.xlane.xlu0 %940 }
 0x582   : > { %v951_v12 = vsub.f32 %v3280_v16, %v941_v11 }
 0x583   : > { %v962_v13 = vmul.f32 1.442695, %v950_v10 }
 0x584   : > { %v964_v19 = vmul.f32 1.442695, %v951_v12  ;;  %v945_v20 = vpop.xlane.xlu1 %944 }
 0x585   : > { %2482 = vpow2.f32 %v962_v13  ;;  %v953_v21 = vsub.f32 %v3285_v17, %v945_v20  ;;  %v1173_v23 = vpop.permute.xlu0 %1172 }
 0x586   : > { %2484 = vpow2.f32 %v964_v19  ;;  %v1207_v27 = vsel %vm514_vm2, %v1173_v23, 0 }
 0x587   : > { %v968_v14 = vmul.f32 1.442695, %v953_v21  ;;  %2237 = vmatpush3.bf16.xpose.msra.mxu1 %v1204_v24  ;;  %2486 = vpow2.f32 %v966_v18 }
 0x588   : > { %2344 = vmatprep.subr.msk.bf16.mxu1 %vm514_vm2, %v1173_v23  ;;  %v1175_v15 = vpop.permute.xlu1 %1174 }
 0x589   : > { %2488 = vpow2.f32 %v968_v14  ;;  %v1149_v25 = vpop.permute.xlu0 %1148  ;;  %v1210_v48 = vsel %vm514_vm2, %v1175_v15, 0 }
 0x58c   : > { %v1151_v16 = vpop.permute.xlu1 %1150 }
 0x58d   : > { %v1153_v26 = vpop.permute.xlu0 %1152 }
 0x58f   : > { %v3342_v28 = vpop.eup %2482  ;;  %2239 = vmatpush3.bf16.xpose.msra.mxu1 %v1207_v27 }
 0x590   : > { %v3344_v17 = vpop.eup %2484  ;;  %2345 = vmatprep.subr.msk.bf16.mxu1 %vm514_vm2, %v1175_v15  ;;  %v1155_v32 = vpop.permute.xlu1 %1154 }
 0x591   : > { %v1338_v33 = vpop.permute.xlu0 %1337  ;;  %v988_v34 = vpack.c.bf16 %v3344_v17, %v3342_v28  ;;  %v3349_v38 = vpop.eup %2486 }
 0x592   : > { %2250 = vmatprep.subr.bf16.mxu0 %v1338_v33 }
 0x593   : > { %v3351_v39 = vpop.eup %2488  ;;  %2222 = vmatprep.mubr.bf16.mxu1 %v988_v34  ;;  %2251 = vmatpush3.bf16.msra.mxu0 %v1338_v33 }
 0x594   : > { %v1340_v42 = vpop.permute.xlu1 %1339  ;;  %v989_v46 = vpack.c.bf16 %v3351_v39, %v3349_v38 }
 0x595   : > { %2252 = vmatprep.subr.bf16.mxu0 %v1340_v42  ;;  %v1344_v3 = vpop.permute.xlu0 %1343 }
 0x596   : > { %2223 = vmatmul.mubr.bf16.gmra.mrb[12].mxu1 %v989_v46 }
 0x597   : > { %2241 = vmatpush3.bf16.xpose.msra.mxu1 %v1210_v48  ;;  %2242 = vmatprep.mubr.msk.bf16.mxu1 %vm514_vm2, %v1149_v25 }
 0x598   : > { %2253 = vmatpush3.bf16.msra.mxu0 %v1340_v42  ;;  %v1342_v2 = vpop.permute.xlu1 %1341 }
 0x599   : > { %2254 = vmatprep.subr.bf16.mxu0 %v1342_v2  ;;  %v1350_v49 = vpop.permute.xlu0 %1349 }
 0x59c   : > { %2255 = vmatpush3.bf16.msra.mxu0 %v1342_v2  ;;  %v1346_v4 = vpop.permute.xlu1 %1345 }
 0x59d   : > { %2256 = vmatprep.subr.bf16.mxu0 %v1344_v3  ;;  %v3360_v7 = vpop.permute.xlu0 %1507 }
 0x59e   : > { %2243 = vmatmul.mubr.msk.bf16.vlgmr.msra.gmra.mrb[16].mxu1 %vm514_vm2, %v1151_v16 }
 0x59f   : > { %2246 = vmatprep.mubr.msk.bf16.mxu1 %vm514_vm2, %v1153_v26 }
 0x5a0   : > { %2257 = vmatpush3.bf16.msra.mxu0 %v1344_v3  ;;  %v1348_v5 = vpop.permute.xlu1 %1347 }
 0x5a1   : > { %2258 = vmatprep.subr.bf16.mxu0 %v1346_v4 }
 0x5a4   : > { %2259 = vmatpush3.bf16.msra.mxu0 %v1346_v4  ;;  %v1352_v6 = vpop.permute.xlu1 %1351 }
 0x5a5   : > { %2260 = vmatprep.subr.bf16.mxu0 %v1348_v5 }
 0x5a6   : > { %2247 = vmatmul.mubr.msk.bf16.gmra.mrb[20].mxu1 %vm514_vm2, %v1155_v32 }
 0x5a8   : > { %2261 = vmatpush3.bf16.msra.mxu0 %v1348_v5 }
 0x5a9   : > { %2262 = vmatprep.subr.bf16.mxu0 %v1350_v49 }
 0x5ac   : > { %2263 = vmatpush3.bf16.msra.mxu0 %v1350_v49 }
 0x5ad   : > { %2264 = vmatprep.subr.bf16.mxu0 %v1352_v6 }
 0x5b0   : > { %2265 = vmatpush3.bf16.msra.mxu0 %v1352_v6 }
 0x5b1   : > { %2346 = vmatprep.subr.msk.bf16.mxu0 %vm514_vm2, %v3360_v7 }
 0x631   : > { %v3364_v8 = vpop.f32.mrb[8].mxu1 }
 0x632   : > { %v3366_v9 = vpop.f32.mrb[9].mxu1 }
 0x633   : > { %v3368_v10 = vpop.f32.mrb[10].mxu1 }
 0x634   : > { %v3370_v11 = vpop.f32.mrb[11].mxu1 }
 0x669   : > { %v3372_v12 = vpop.f32.mrb[12].mxu1 }
 0x66a   : > { %v3374_v13 = vpop.f32.mrb[13].mxu1 }
 0x66b   : > { %v3376_v18 = vpop.f32.mrb[14].mxu1 }
 0x66c   : > { %v3378_v19 = vpop.f32.mrb[15].mxu1 }
 0x671   : > { %v2244_v20 = vpop.f32.mrb[16].mxu1 }
 0x672   : > { %v1255_v21 = vadd.f32 %v2244_v20, %v3142_v22  ;;  %v1246_v23 = vpop.f32.mrb[17].mxu1 }
 0x673   : > { %v2245_v24 = vpop.f32.mrb[18].mxu1  ;;  %v1247_v25 = vadd.f32 %v3142_v22, %v1246_v23 }
 0x674   : > { %1281 = vmax.xlane.f32.xlu0 %v1255_v21  ;;  %v1249_v14 = vpop.f32.mrb[19].mxu1  ;;  %v1258_v26 = vadd.f32 %v2245_v24, %v3142_v22 }
 0x675   : > { %v1250_v15 = vadd.f32 %v3142_v22, %v1249_v14 }
 0x677   : > { %1279 = vmax.xlane.f32.xlu1 %v1250_v15 }
 0x678   : > { %1277 = vmax.xlane.f32.xlu0 %v1247_v25 }
 0x679   : > { %v2248_v16 = vpop.f32.mrb[20].mxu1 }
 0x67a   : > { %v1262_v27 = vpop.f32.mrb[21].mxu1  ;;  %v3389_v34 = vadd.f32 %v2248_v16, %v3142_v22  ;;  %v1536_v16 = vsel %vm514_vm2, %v3360_v7, 0 }
 0x67b   : > { %v2249_v32 = vpop.f32.mrb[22].mxu1  ;;  %v3393_v42 = vadd.f32 %v3142_v22, %v1262_v27 }
 0x67c   : > { %1283 = vmax.xlane.f32.xlu0 %v1258_v26  ;;  %v1265_v33 = vpop.f32.mrb[23].mxu1 }
 0x67d   : > { %v3396_v46 = vadd.f32 %v3142_v22, %v1265_v33 }
 0x688   : > { %1515 = vrot.lane.b32.xlu1 %v3081_v56, %s2795_s6  ;;  %v3401_v56 = vadd.f32 %v2249_v32, %v3142_v22 }
 0x692   : > { %1517 = vrot.lane.b32.xlu0 %v3078_v55, %s2795_s6  ;;  %v1512_v55 = vpop.permute.xlu0 %1511 }
 0x693   : > { %v1542_v27 = vsel %vm514_vm2, %v1512_v55, 0 }
 0x6ac   : > { %1289 = vmax.xlane.f32.xlu1 %v3389_v34 }
 0x6b0   : > { %1285 = vmax.xlane.f32.xlu1 %v3393_v42 }
 0x6b1   : > { %1287 = vmax.xlane.f32.xlu0 %v3396_v46 }
 0x6b4   : > { %1291 = vmax.xlane.f32.xlu1 %v3401_v56 }
 0x6c5   : > { %1521 = vrot.lane.b32.xlu1 %v3088_v57, %s2795_s6  ;;  %v1514_v57 = vpop.permute.xlu0 %1513 }
 0x6c6   : > { %v1545_v32 = vsel %vm514_vm2, %v1514_v57, 0 }
 0x6c7   : > { %1519 = vrot.lane.b32.xlu0 %v3092_v58, %s2795_s6  ;;  %v1510_v58 = vpop.permute.xlu1 %1509 }
 0x6c9   : > { %1497 = vrot.lane.b32.xlu1 %v3064_v37, %s2796_s29 }
 0x6cb   : > { %1495 = vrot.lane.b32.xlu0 %v3057_v31, %s2796_s29 }
 0x6cd   : > { %1501 = vrot.lane.b32.xlu1 %v3074_v47, %s2796_s29 }
 0x6cf   : > { %1499 = vrot.lane.b32.xlu0 %v3069_v43, %s2796_s29 }
 0x6d1   : > { %1686 = vrot.lane.b32.xlu1 %v3064_v37, %s2797_s7 }
 0x6d3   : > { %1684 = vrot.lane.b32.xlu0 %v3057_v31, %s2797_s7 }
 0x6d7   : > { %1688 = vrot.lane.b32.xlu0 %v3069_v43, %s2797_s7 }
 0x701   : > { %v1282_v48 = vpop.xlane.xlu0 %1281 }
 0x702   : > { %v1295_v3 = vsub.f32 %v1255_v21, %v1282_v48 }
 0x704   : > { %v1280_v2 = vpop.xlane.xlu1 %1279  ;;  %v1305_v20 = vmul.f32 1.442695, %v1295_v3 }
 0x705   : > { %v1294_v4 = vsub.f32 %v1250_v15, %v1280_v2  ;;  %v1278_v47 = vpop.xlane.xlu0 %1277 }
 0x706   : > { %v1293_v5 = vsub.f32 %v1247_v25, %v1278_v47 }
 0x707   : > { %v1303_v49 = vmul.f32 1.442695, %v1294_v4 }
 0x708   : > { %v1301_v6 = vmul.f32 1.442695, %v1293_v5  ;;  %v1516_v33 = vpop.permute.xlu1 %1515 }
 0x709   : > { %2490 = vpow2.f32 %v1303_v49  ;;  %v1284_v37 = vpop.xlane.xlu0 %1283  ;;  %v1548_v2 = vsel %vm514_vm2, %v1516_v33, 0 }
 0x70a   : > { %2492 = vpow2.f32 %v1301_v6  ;;  %v1296_v23 = vsub.f32 %v1258_v26, %v1284_v37  ;;  %v1539_v26 = vsel %vm514_vm2, %v1510_v58, 0 }
 0x70b   : > { %2494 = vpow2.f32 %v1305_v20 }
 0x70c   : > { %v1307_v31 = vmul.f32 1.442695, %v1296_v23 }
 0x70d   : > { %v1518_v48 = vpop.permute.xlu0 %1517 }
 0x70e   : > { %2496 = vpow2.f32 %v1307_v31  ;;  %v1551_v23 = vsel %vm514_vm2, %v1518_v48, 0 }
 0x713   : > { %v3418_v43 = vpop.eup %2490 }
 0x714   : > { %v3420_v24 = vpop.eup %2492 }
 0x715   : > { %v1333_v21 = vpack.c.bf16 %v3418_v43, %v3420_v24  ;;  %v3424_v14 = vpop.eup %2494 }
 0x717   : > { %2266 = vmatprep.mubr.bf16.mxu0 %v1333_v21 }
 0x718   : > { %v3426_v15 = vpop.eup %2496 }
 0x719   : > { %v1334_v25 = vpack.c.bf16 %v3426_v15, %v3424_v14 }
 0x71b   : > { %2267 = vmatmul.mubr.bf16.vlgmr.msra.gmra.mrb[32].mxu0 %v1334_v25 }
 0x71c   : > { %2275 = vmatpush3.bf16.xpose.msra.mxu0 %v1536_v16 }
 0x71d   : > { %2347 = vmatprep.subr.msk.bf16.mxu0 %vm514_vm2, %v1510_v58 }
 0x724   : > { %2277 = vmatpush3.bf16.xpose.msra.mxu0 %v1539_v26 }
 0x725   : > { %2348 = vmatprep.subr.msk.bf16.mxu0 %vm514_vm2, %v1512_v55 }
 0x72c   : > { %2279 = vmatpush3.bf16.xpose.msra.mxu0 %v1542_v27 }
 0x72d   : > { %2349 = vmatprep.subr.msk.bf16.mxu0 %vm514_vm2, %v1514_v57 }
 0x734   : > { %2281 = vmatpush3.bf16.xpose.msra.mxu0 %v1545_v32 }
 0x735   : > { %2350 = vmatprep.subr.msk.bf16.mxu0 %vm514_vm2, %v1516_v33 }
 0x739   : > { %v1290_v7 = vpop.xlane.xlu1 %1289 }
 0x73a   : > { %v1299_v58 = vsub.f32 %v3389_v34, %v1290_v7 }
 0x73c   : > { %2283 = vmatpush3.bf16.xpose.msra.mxu0 %v1548_v2  ;;  %v1313_v5 = vmul.f32 1.442695, %v1299_v58 }
 0x73d   : > { %2351 = vmatprep.subr.msk.bf16.mxu0 %vm514_vm2, %v1518_v48  ;;  %v1286_v3 = vpop.xlane.xlu1 %1285 }
 0x73e   : > { %v1297_v55 = vsub.f32 %v3393_v42, %v1286_v3  ;;  %v1288_v4 = vpop.xlane.xlu0 %1287 }
 0x73f   : > { %v1298_v47 = vsub.f32 %v3396_v46, %v1288_v4 }
 0x740   : > { %v1309_v57 = vmul.f32 1.442695, %v1297_v55 }
 0x741   : > { %v1311_v49 = vmul.f32 1.442695, %v1298_v47  ;;  %v1292_v6 = vpop.xlane.xlu1 %1291 }
 0x742   : > { %2498 = vpow2.f32 %v1309_v57  ;;  %v1300_v20 = vsub.f32 %v3401_v56, %v1292_v6  ;;  %v1520_v37 = vpop.permute.xlu0 %1519 }
 0x743   : > { %2500 = vpow2.f32 %v1311_v49  ;;  %v1554_v25 = vsel %vm514_vm2, %v1520_v37, 0 }
 0x744   : > { %v1315_v34 = vmul.f32 1.442695, %v1300_v20  ;;  %2285 = vmatpush3.bf16.xpose.msra.mxu0 %v1551_v23  ;;  %2502 = vpow2.f32 %v1313_v5 }
 0x745   : > { %2352 = vmatprep.subr.msk.bf16.mxu0 %vm514_vm2, %v1520_v37  ;;  %v1522_v42 = vpop.permute.xlu1 %1521 }
 0x746   : > { %2504 = vpow2.f32 %v1315_v34  ;;  %v1496_v31 = vpop.permute.xlu0 %1495  ;;  %v1557_v58 = vsel %vm514_vm2, %v1522_v42, 0 }
 0x749   : > { %v1498_v46 = vpop.permute.xlu1 %1497 }
 0x74a   : > { %v1500_v21 = vpop.permute.xlu0 %1499 }
 0x74c   : > { %v3448_v16 = vpop.eup %2498  ;;  %2287 = vmatpush3.bf16.xpose.msra.mxu0 %v1554_v25 }
 0x74d   : > { %v3450_v56 = vpop.eup %2500  ;;  %2353 = vmatprep.subr.msk.bf16.mxu0 %vm514_vm2, %v1522_v42  ;;  %v1502_v26 = vpop.permute.xlu1 %1501 }
 0x74e   : > { %v1685_v27 = vpop.permute.xlu0 %1684  ;;  %v1335_v32 = vpack.c.bf16 %v3450_v56, %v3448_v16  ;;  %v3455_v33 = vpop.eup %2502 }
 0x74f   : > { %2298 = vmatprep.subr.bf16.mxu1 %v1685_v27 }
 0x750   : > { %v3457_v7 = vpop.eup %2504  ;;  %2270 = vmatprep.mubr.bf16.mxu0 %v1335_v32  ;;  %2299 = vmatpush3.bf16.msra.mxu1 %v1685_v27 }
 0x751   : > { %v1687_v48 = vpop.permute.xlu1 %1686  ;;  %v1336_v2 = vpack.c.bf16 %v3457_v7, %v3455_v33 }
 0x752   : > { %2300 = vmatprep.subr.bf16.mxu1 %v1687_v48  ;;  %v1689_v3 = vpop.permute.xlu0 %1688 }
 0x753   : > { %2271 = vmatmul.mubr.bf16.gmra.mrb[36].mxu0 %v1336_v2 }
 0x754   : > { %2289 = vmatpush3.bf16.xpose.msra.mxu0 %v1557_v58  ;;  %2290 = vmatprep.mubr.msk.bf16.mxu0 %vm514_vm2, %v1496_v31 }
 0x755   : > { %2301 = vmatpush3.bf16.msra.mxu1 %v1687_v48 }
 0x756   : > { %2302 = vmatprep.subr.bf16.mxu1 %v1689_v3 }
 0x759   : > { %2303 = vmatpush3.bf16.msra.mxu1 %v1689_v3 }
 0x75b   : > { %2291 = vmatmul.mubr.msk.bf16.vlgmr.msra.gmra.mrb[40].mxu0 %vm514_vm2, %v1498_v46 }
 0x75c   : > { %2294 = vmatprep.mubr.msk.bf16.mxu0 %vm514_vm2, %v1500_v21 }
 0x763   : > { %2295 = vmatmul.mubr.msk.bf16.gmra.mrb[44].mxu0 %vm514_vm2, %v1502_v26 }
 0x7ee   : > { %v3466_v55 = vpop.f32.mrb[32].mxu0 }
 0x7ef   : > { %v3468_v4 = vpop.f32.mrb[33].mxu0 }
 0x7f0   : > { %v3470_v47 = vpop.f32.mrb[34].mxu0 }
 0x7f1   : > { %v3472_v57 = vpop.f32.mrb[35].mxu0 }
 0x826   : > { %v3474_v5 = vpop.f32.mrb[36].mxu0 }
 0x827   : > { %v3476_v49 = vpop.f32.mrb[37].mxu0 }
 0x828   : > { %v3478_v6 = vpop.f32.mrb[38].mxu0 }
 0x829   : > { %v3480_v20 = vpop.f32.mrb[39].mxu0 }
 0x82e   : > { %v2292_v37 = vpop.f32.mrb[40].mxu0 }
 0x82f   : > { %v1602_v23 = vadd.f32 %v2292_v37, %v3142_v22  ;;  %v1593_v34 = vpop.f32.mrb[41].mxu0 }
 0x830   : > { %v1594_v42 = vadd.f32 %v3142_v22, %v1593_v34  ;;  %v2293_v31 = vpop.f32.mrb[42].mxu0  ;;  %v2586_v34 = vld [vmem:[#allocation2 + $0x20] sm:$0xff] }
 0x831   : > { %1628 = vmax.xlane.f32.xlu1 %v1602_v23  ;;  %v1596_v46 = vpop.f32.mrb[43].mxu0  ;;  %v1605_v21 = vadd.f32 %v2293_v31, %v3142_v22  ;;  %v2587_v31 = vld [vmem:[#allocation2 + $0x28] sm:$0xff] }
 0x832   : > { %1624 = vmax.xlane.f32.xlu0 %v1594_v42  ;;  %v1597_v26 = vadd.f32 %v3142_v22, %v1596_v46  ;;  %v2588_v46 = vld [vmem:[#allocation2 + $0x18] sm:$0xff] }
 0x835   : > { %1630 = vmax.xlane.f32.xlu1 %v1605_v21 }
 0x836   : > { %v2296_v25 = vpop.f32.mrb[44].mxu0 }
 0x837   : > { %v1609_v27 = vpop.f32.mrb[45].mxu0  ;;  %v1618_v58 = vadd.f32 %v2296_v25, %v3142_v22  ;;  %v2590_v25 = vld [vmem:[#allocation2 + $0x38] sm:$0xff] }
 0x838   : > { %v1610_v32 = vadd.f32 %v3142_v22, %v1609_v27  ;;  %v2297_v48 = vpop.f32.mrb[46].mxu0  ;;  %v2589_v27 = vld [vmem:[#allocation2 + $0x30] sm:$0xff] }
 0x839   : > { %1626 = vmax.xlane.f32.xlu1 %v1597_v26  ;;  %v1612_v2 = vpop.f32.mrb[47].mxu0  ;;  %v1621_v3 = vadd.f32 %v2297_v48, %v3142_v22 }
 0x83a   : > { %1632 = vmax.xlane.f32.xlu0 %v1610_v32  ;;  %v3490_v37 = vadd.f32 %v3142_v22, %v1612_v2 }
 0x83d   : > { %1636 = vmax.xlane.f32.xlu1 %v1618_v58 }
 0x841   : > { %1638 = vmax.xlane.f32.xlu1 %v1621_v3 }
 0x845   : > { %1634 = vmax.xlane.f32.xlu1 %v3490_v37 }
 0x850   : > { %1692 = vrot.lane.b32.xlu0 %v2586_v34, %s2797_s7 }
 0x854   : > { %1694 = vrot.lane.b32.xlu0 %v2587_v31, %s2797_s7 }
 0x856   : > { %1690 = vrot.lane.b32.xlu1 %v2588_v46, %s2797_s7 }
 0x858   : > { %1696 = vrot.lane.b32.xlu0 %v2589_v27, %s2797_s7 }
 0x85c   : > { %1698 = vrot.lane.b32.xlu0 %v2590_v25, %s2797_s7 }
 0x87a   : > { %972 = vadd.xlane.f32.xlu1 %v3312_v40 }
 0x87b   : > { %970 = vadd.xlane.f32.xlu0 %v3314_v41 }
 0x87e   : > { %978 = vadd.xlane.f32.xlu1 %v3342_v28 }
 0x87f   : > { %974 = vadd.xlane.f32.xlu0 %v3318_v44 }
 0x882   : > { %982 = vadd.xlane.f32.xlu1 %v3349_v38 }
 0x883   : > { %976 = vadd.xlane.f32.xlu0 %v3320_v45 }
 0x886   : > { %1317 = vadd.xlane.f32.xlu1 %v3420_v24 }
 0x887   : > { %980 = vadd.xlane.f32.xlu0 %v3344_v17 }
 0x88a   : > { %1321 = vadd.xlane.f32.xlu1 %v3424_v14 }
 0x88b   : > { %984 = vadd.xlane.f32.xlu0 %v3351_v39 }
 0x88e   : > { %1325 = vadd.xlane.f32.xlu1 %v3448_v16 }
 0x88f   : > { %1319 = vadd.xlane.f32.xlu0 %v3418_v43 }
 0x892   : > { %1329 = vadd.xlane.f32.xlu1 %v3455_v33 }
 0x893   : > { %1323 = vadd.xlane.f32.xlu0 %v3426_v15 }
 0x896   : > { %656 = vadd.xlane.f32.xlu1 %v3194_v61 }
 0x897   : > { %1327 = vadd.xlane.f32.xlu0 %v3450_v56 }
 0x89b   : > { %1331 = vadd.xlane.f32.xlu0 %v3457_v7 }
 0x8be   : > { %v1629_v22 = vpop.xlane.xlu1 %1628 }
 0x8bf   : > { %v1642_v40 = vsub.f32 %v1602_v23, %v1629_v22  ;;  %v1625_v41 = vpop.xlane.xlu0 %1624 }
 0x8c0   : > { %v1640_v44 = vsub.f32 %v1594_v42, %v1625_v41 }
 0x8c1   : > { %v1652_v45 = vmul.f32 1.442695, %v1642_v40 }
 0x8c2   : > { %v1648_v28 = vmul.f32 1.442695, %v1640_v44  ;;  %v1631_v17 = vpop.xlane.xlu1 %1630 }
 0x8c3   : > { %2506 = vpow2.f32 %v1652_v45  ;;  %v1643_v38 = vsub.f32 %v1605_v21, %v1631_v17 }
 0x8c4   : > { %2508 = vpow2.f32 %v1648_v28 }
 0x8c5   : > { %v1654_v39 = vmul.f32 1.442695, %v1643_v38 }
 0x8c6   : > { %v1627_v43 = vpop.xlane.xlu1 %1626 }
 0x8c7   : > { %2510 = vpow2.f32 %v1654_v39  ;;  %v1641_v24 = vsub.f32 %v1597_v26, %v1627_v43  ;;  %v1633_v14 = vpop.xlane.xlu0 %1632 }
 0x8c8   : > { %v1644_v15 = vsub.f32 %v1610_v32, %v1633_v14 }
 0x8c9   : > { %v1650_v61 = vmul.f32 1.442695, %v1641_v24 }
 0x8ca   : > { %v1637_v16 = vpop.xlane.xlu1 %1636  ;;  %v1656_v23 = vmul.f32 1.442695, %v1644_v15 }
 0x8cb   : > { %2512 = vpow2.f32 %v1650_v61  ;;  %v1646_v56 = vsub.f32 %v1618_v58, %v1637_v16  ;;  %v1693_v31 = vpop.permute.xlu0 %1692 }
 0x8cd   : > { %v2507_v33 = vpop.eup %2506  ;;  %v1660_v7 = vmul.f32 1.442695, %v1646_v56 }
 0x8ce   : > { %v1639_v42 = vpop.xlane.xlu1 %1638  ;;  %1668 = vadd.xlane.f32.xlu1 %v2507_v33  ;;  %v2509_v2 = vpop.eup %2508 }
 0x8cf   : > { %2514 = vpow2.f32 %v1660_v7  ;;  %v1647_v48 = vsub.f32 %v1621_v3, %v1639_v42  ;;  %v1695_v22 = vpop.permute.xlu0 %1694 }
 0x8d0   : > { %2516 = vpow2.f32 %v1656_v23 }
 0x8d1   : > { %v2511_v21 = vpop.eup %2510  ;;  %v1662_v34 = vmul.f32 1.442695, %v1647_v48 }
 0x8d2   : > { %v1635_v46 = vpop.xlane.xlu1 %1634  ;;  %1670 = vadd.xlane.f32.xlu0 %v2511_v21  ;;  %1664 = vadd.xlane.f32.xlu1 %v2509_v2  ;;  %v1681_v28 = vpack.c.bf16 %v2511_v21, %v2507_v33 }
 0x8d3   : > { %2518 = vpow2.f32 %v1662_v34  ;;  %v1645_v26 = vsub.f32 %v3490_v37, %v1635_v46  ;;  %v1697_v44 = vpop.permute.xlu0 %1696 }
 0x8d5   : > { %v2513_v32 = vpop.eup %2512  ;;  %v1658_v58 = vmul.f32 1.442695, %v1645_v26 }
 0x8d6   : > { %v1691_v27 = vpop.permute.xlu1 %1690  ;;  %1666 = vadd.xlane.f32.xlu0 %v2513_v32  ;;  %v1680_v25 = vpack.c.bf16 %v2513_v32, %v2509_v2 }
 0x8d7   : > { %2520 = vpow2.f32 %v1658_v58  ;;  %2304 = vmatprep.subr.bf16.mxu1 %v1691_v27  ;;  %v1699_v45 = vpop.permute.xlu0 %1698 }
 0x8d8   : > { %2305 = vmatpush3.bf16.msra.mxu1 %v1691_v27  ;;  %2314 = vmatprep.mubr.bf16.mxu1 %v1680_v25 }
 0x8d9   : > { %v2515_v3 = vpop.eup %2514  ;;  %2306 = vmatprep.subr.bf16.mxu1 %v1693_v31 }
 0x8da   : > { %1676 = vadd.xlane.f32.xlu1 %v2515_v3  ;;  %v2517_v40 = vpop.eup %2516 }
 0x8dc   : > { %2307 = vmatpush3.bf16.msra.mxu1 %v1693_v31 }
 0x8dd   : > { %v2519_v41 = vpop.eup %2518  ;;  %2308 = vmatprep.subr.bf16.mxu1 %v1695_v22 }
 0x8de   : > { %1678 = vadd.xlane.f32.xlu0 %v2519_v41  ;;  %1672 = vadd.xlane.f32.xlu1 %v2517_v40  ;;  %v1683_v38 = vpack.c.bf16 %v2519_v41, %v2515_v3 }
 0x8e0   : > { %2309 = vmatpush3.bf16.msra.mxu1 %v1695_v22 }
 0x8e1   : > { %v2521_v37 = vpop.eup %2520  ;;  %2310 = vmatprep.subr.bf16.mxu1 %v1697_v44 }
 0x8e2   : > { %1674 = vadd.xlane.f32.xlu0 %v2521_v37  ;;  %660 = vadd.xlane.f32.xlu1 %v3198_v63  ;;  %v1682_v17 = vpack.c.bf16 %v2521_v37, %v2517_v40 }
 0x8e4   : > { %2311 = vmatpush3.bf16.msra.mxu1 %v1697_v44 }
 0x8e5   : > { %2312 = vmatprep.subr.bf16.mxu1 %v1699_v45 }
 0x8e6   : > { %658 = vadd.xlane.f32.xlu0 %v3192_v60  ;;  %664 = vadd.xlane.f32.xlu1 %v3226_v29 }
 0x8e8   : > { %2313 = vmatpush3.bf16.msra.mxu1 %v1699_v45 }
 0x8ea   : > { %662 = vadd.xlane.f32.xlu0 %v3200_v0  ;;  %668 = vadd.xlane.f32.xlu1 %v3233_v35 }
 0x8eb   : > { %2315 = vmatmul.mubr.bf16.vlgmr.msra.gmra.mrb[24].mxu1 %v1681_v28 }
 0x8ec   : > { %2318 = vmatprep.mubr.bf16.mxu1 %v1682_v17 }
 0x8ee   : > { %666 = vadd.xlane.f32.xlu0 %v3228_v30 }
 0x8f2   : > { %670 = vadd.xlane.f32.xlu0 %v3235_v36 }
 0x8f3   : > { %2319 = vmatmul.mubr.bf16.gmra.mrb[28].mxu1 %v1683_v38 }
 0x907   : > { %v973_v63 = vpop.xlane.xlu1 %972 }
 0x908   : > { %2522 = vrcp.f32 %v973_v63  ;;  %v971_v60 = vpop.xlane.xlu0 %970 }
 0x909   : > { %2524 = vrcp.f32 %v971_v60 }
 0x90b   : > { %v979_v29 = vpop.xlane.xlu1 %978 }
 0x90c   : > { %2526 = vrcp.f32 %v979_v29  ;;  %v975_v39 = vpop.xlane.xlu0 %974 }
 0x90d   : > { %2528 = vrcp.f32 %v975_v39 }
 0x90f   : > { %v983_v0 = vpop.xlane.xlu1 %982 }
 0x910   : > { %2530 = vrcp.f32 %v983_v0  ;;  %v977_v35 = vpop.xlane.xlu0 %976 }
 0x911   : > { %2532 = vrcp.f32 %v977_v35 }
 0x912   : > { %v2523_v43 = vpop.eup %2522 }
 0x913   : > { %v2525_v24 = vpop.eup %2524  ;;  %v1318_v14 = vpop.xlane.xlu1 %1317  ;;  %v1088_v30 = vmul.f32 %v2523_v43, %v3370_v11 }
 0x914   : > { %2534 = vrcp.f32 %v1318_v14  ;;  %v981_v36 = vpop.xlane.xlu0 %980  ;;  %v1087_v61 = vmul.f32 %v2525_v24, %v3366_v9 }
 0x915   : > { %2536 = vrcp.f32 %v981_v36  ;;  %1105 = vrot.lane.b32.xlu0 %v1088_v30, %s2798_s9 }
 0x916   : > { %v2527_v15 = vpop.eup %2526  ;;  %1103 = vrot.lane.b32.xlu1 %v1087_v61, %s2798_s9 }
 0x917   : > { %v2529_v16 = vpop.eup %2528  ;;  %v1322_v56 = vpop.xlane.xlu1 %1321  ;;  %v1091_v33 = vmul.f32 %v2527_v15, %v3374_v13 }
 0x918   : > { %2538 = vrcp.f32 %v1322_v56  ;;  %v985_v7 = vpop.xlane.xlu0 %984  ;;  %v1089_v23 = vmul.f32 %v2529_v16, %v3364_v8 }
 0x919   : > { %2540 = vrcp.f32 %v985_v7  ;;  %1111 = vrot.lane.b32.xlu0 %v1091_v33, %s2798_s9 }
 0x91a   : > { %v2531_v11 = vpop.eup %2530  ;;  %1107 = vrot.lane.b32.xlu1 %v1089_v23, %s2798_s9 }
 0x91b   : > { %v2533_v9 = vpop.eup %2532  ;;  %v1326_v42 = vpop.xlane.xlu1 %1325  ;;  %v1093_v48 = vmul.f32 %v2531_v11, %v3372_v12 }
 0x91c   : > { %2542 = vrcp.f32 %v1326_v42  ;;  %v1320_v2 = vpop.xlane.xlu0 %1319  ;;  %v1090_v21 = vmul.f32 %v2533_v9, %v3368_v10 }
 0x91d   : > { %2544 = vrcp.f32 %v1320_v2  ;;  %1115 = vrot.lane.b32.xlu0 %v1093_v48, %s2798_s9 }
 0x91e   : > { %v2535_v13 = vpop.eup %2534  ;;  %1109 = vrot.lane.b32.xlu1 %v1090_v21, %s2798_s9 }
 0x91f   : > { %v2537_v8 = vpop.eup %2536  ;;  %v1330_v34 = vpop.xlane.xlu1 %1329  ;;  %v1434_v31 = vmul.f32 %v2535_v13, %v3468_v4 }
 0x920   : > { %2546 = vrcp.f32 %v1330_v34  ;;  %v1324_v46 = vpop.xlane.xlu0 %1323  ;;  %v1092_v26 = vmul.f32 %v2537_v8, %v3378_v19 }
 0x921   : > { %2548 = vrcp.f32 %v1324_v46  ;;  %1450 = vrot.lane.b32.xlu0 %v1434_v31, %s2799_s13 }
 0x922   : > { %v2539_v12 = vpop.eup %2538  ;;  %1113 = vrot.lane.b32.xlu1 %v1092_v26, %s2798_s9 }
 0x923   : > { %v2541_v10 = vpop.eup %2540  ;;  %v657_v32 = vpop.xlane.xlu1 %656  ;;  %v1436_v58 = vmul.f32 %v2539_v12, %v3466_v55 }
 0x924   : > { %2550 = vrcp.f32 %v657_v32  ;;  %v1328_v27 = vpop.xlane.xlu0 %1327  ;;  %v1094_v25 = vmul.f32 %v2541_v10, %v3376_v18 }
 0x925   : > { %2552 = vrcp.f32 %v1328_v27  ;;  %1454 = vrot.lane.b32.xlu0 %v1436_v58, %s2799_s13 }
 0x926   : > { %v2543_v4 = vpop.eup %2542  ;;  %1117 = vrot.lane.b32.xlu1 %v1094_v25, %s2798_s9 }
 0x927   : > { %v2545_v19 = vpop.eup %2544  ;;  %v1438_v22 = vmul.f32 %v2543_v4, %v3476_v49 }
 0x928   : > { %v1332_v3 = vpop.xlane.xlu0 %1331  ;;  %v1435_v40 = vmul.f32 %v2545_v19, %v3472_v57 }
 0x929   : > { %2554 = vrcp.f32 %v1332_v3  ;;  %1458 = vrot.lane.b32.xlu0 %v1438_v22, %s2799_s13 }
 0x92a   : > { %v2547_v55 = vpop.eup %2546  ;;  %1452 = vrot.lane.b32.xlu1 %v1435_v40, %s2799_s13 }
 0x92b   : > { %v2549_v18 = vpop.eup %2548  ;;  %v1440_v41 = vmul.f32 %v2547_v55, %v3474_v5 }
 0x92c   : > { %v1437_v44 = vmul.f32 %v2549_v18, %v3470_v47 }
 0x92d   : > { %1462 = vrot.lane.b32.xlu0 %v1440_v41, %s2799_s13 }
 0x92e   : > { %v2551_v37 = vpop.eup %2550  ;;  %1456 = vrot.lane.b32.xlu1 %v1437_v44, %s2799_s13 }
 0x92f   : > { %v2553_v49 = vpop.eup %2552  ;;  %v773_v45 = vmul.f32 %v2551_v37, %v3250_v51 }
 0x930   : > { %v1439_v57 = vmul.f32 %v2553_v49, %v3480_v20 }
 0x931   : > { %781 = vst.msk [vmem:[%s3555_s5] sm:$0xff] %vm514_vm2, %v773_v45 }
 0x932   : > { %1460 = vrot.lane.b32.xlu1 %v1439_v57, %s2799_s13 }
 0x933   : > { %v2555_v5 = vpop.eup %2554 }
 0x934   : > { %v1441_v47 = vmul.f32 %v2555_v5, %v3478_v6 }
 0x936   : > { %1464 = vrot.lane.b32.xlu1 %v1441_v47, %s2799_s13 }
 0x95b   : > { %v3562_v28 = vpop.xlane.xlu1 %1668 }
 0x95f   : > { %v3564_v17 = vpop.xlane.xlu0 %1670  ;;  %v3566_v51 = vpop.xlane.xlu1 %1664 }
 0x963   : > { %v3568_v20 = vpop.xlane.xlu0 %1666 }
 0x967   : > { %v3570_v38 = vpop.xlane.xlu1 %1676 }
 0x96b   : > { %v3572_v63 = vpop.xlane.xlu1 %1672  ;;  %v3574_v60 = vpop.xlane.xlu0 %1678 }
 0x96f   : > { %v661_v29 = vpop.xlane.xlu1 %660  ;;  %v3576_v39 = vpop.xlane.xlu0 %1674 }
 0x970   : > { %2556 = vrcp.f32 %v661_v29 }
 0x973   : > { %v665_v6 = vpop.xlane.xlu1 %664  ;;  %v659_v0 = vpop.xlane.xlu0 %658 }
 0x974   : > { %2558 = vrcp.f32 %v665_v6 }
 0x975   : > { %2560 = vrcp.f32 %v659_v0 }
 0x977   : > { %v669_v35 = vpop.xlane.xlu1 %668  ;;  %v663_v43 = vpop.xlane.xlu0 %662 }
 0x978   : > { %2562 = vrcp.f32 %v669_v35 }
 0x979   : > { %2564 = vrcp.f32 %v663_v43 }
 0x97a   : > { %v2557_v24 = vpop.eup %2556 }
 0x97b   : > { %v775_v14 = vmul.f32 %v2557_v24, %v3248_v50  ;;  %v667_v30 = vpop.xlane.xlu0 %666 }
 0x97c   : > { %2566 = vrcp.f32 %v667_v30 }
 0x97d   : > { %783 = vst.msk [vmem:[%s3555_s5 + $0x10] sm:$0xff] %vm514_vm2, %v775_v14 }
 0x97e   : > { %v2559_v36 = vpop.eup %2558 }
 0x97f   : > { %v2561_v61 = vpop.eup %2560  ;;  %v777_v15 = vmul.f32 %v2559_v36, %v3258_v59  ;;  %v671_v16 = vpop.xlane.xlu0 %670 }
 0x980   : > { %v774_v56 = vmul.f32 %v2561_v61, %v3254_v53  ;;  %2568 = vrcp.f32 %v671_v16 }
 0x981   : > { %785 = vst.msk [vmem:[%s3555_s5 + $0x20] sm:$0xff] %vm514_vm2, %v777_v15  ;;  %2570 = vrcp.f32 %v3562_v28 }
 0x982   : > { %v2563_v50 = vpop.eup %2562  ;;  %782 = vst.msk [vmem:[%s3555_s5 + $0x8] sm:$0xff] %vm514_vm2, %v774_v56  ;;  %2572 = vrcp.f32 %v3566_v51 }
 0x983   : > { %v2565_v33 = vpop.eup %2564  ;;  %v779_v7 = vmul.f32 %v2563_v50, %v3256_v54  ;;  %2574 = vrcp.f32 %v3564_v17 }
 0x984   : > { %v776_v23 = vmul.f32 %v2565_v33, %v3252_v52  ;;  %2576 = vrcp.f32 %v3568_v20 }
 0x985   : > { %787 = vst.msk [vmem:[%s3555_s5 + $0x30] sm:$0xff] %vm514_vm2, %v779_v7  ;;  %2578 = vrcp.f32 %v3570_v38 }
 0x986   : > { %v2567_v53 = vpop.eup %2566  ;;  %784 = vst.msk [vmem:[%s3555_s5 + $0x18] sm:$0xff] %vm514_vm2, %v776_v23  ;;  %2580 = vrcp.f32 %v3572_v63 }
 0x987   : > { %v778_v59 = vmul.f32 %v2567_v53, %v3262_v1  ;;  %v1106_v11 = vpop.permute.xlu0 %1105  ;;  %2582 = vrcp.f32 %v3574_v60 }
 0x988   : > { %1129 = vst.msk [vmem:[%s3555_s5 + $0x8] sm:$0xff] %vm1127_vm3, %v1106_v11  ;;  %v1104_v9 = vpop.permute.xlu1 %1103  ;;  %2584 = vrcp.f32 %v3576_v39 }
 0x989   : > { %786 = vst.msk [vmem:[%s3555_s5 + $0x28] sm:$0xff] %vm514_vm2, %v778_v59 }
 0x98a   : > { %1128 = vst.msk [vmem:[%s3555_s5] sm:$0xff] %vm1127_vm3, %v1104_v9  ;;  %v2569_v52 = vpop.eup %2568 }
 0x98b   : > { %v780_v54 = vmul.f32 %v2569_v52, %v3260_v62  ;;  %v1112_v42 = vpop.permute.xlu0 %1111  ;;  %v2571_v32 = vpop.eup %2570 }
 0x98c   : > { %1132 = vst.msk [vmem:[%s3555_s5 + $0x20] sm:$0xff] %vm1127_vm3, %v1112_v42  ;;  %v1108_v1 = vpop.permute.xlu1 %1107  ;;  %v2573_v27 = vpop.eup %2572 }
 0x98d   : > { %788 = vst.msk [vmem:[%s3555_s5 + $0x38] sm:$0xff] %vm514_vm2, %v780_v54  ;;  %v2575_v19 = vpop.eup %2574 }
 0x98e   : > { %1130 = vst.msk [vmem:[%s3555_s5 + $0x10] sm:$0xff] %vm1127_vm3, %v1108_v1  ;;  %v2577_v40 = vpop.eup %2576 }
 0x98f   : > { %v1116_v48 = vpop.permute.xlu0 %1115  ;;  %v2579_v44 = vpop.eup %2578 }
 0x990   : > { %1134 = vst.msk [vmem:[%s3555_s5 + $0x30] sm:$0xff] %vm1127_vm3, %v1116_v48  ;;  %v1110_v2 = vpop.permute.xlu1 %1109  ;;  %v2581_v49 = vpop.eup %2580 }
 0x991   : > { %1131 = vst.msk [vmem:[%s3555_s5 + $0x18] sm:$0xff] %vm1127_vm3, %v1110_v2  ;;  %v2583_v5 = vpop.eup %2582 }
 0x992   : > { %v2585_v17 = vpop.eup %2584 }
 0x993   : > { %v1451_v62 = vpop.permute.xlu0 %1450 }
 0x994   : > { %1475 = vst.msk [vmem:[%s3555_s5] sm:$0xff] %vm1474_vm4, %v1451_v62  ;;  %v1114_v21 = vpop.permute.xlu1 %1113 }
 0x995   : > { %1133 = vst.msk [vmem:[%s3555_s5 + $0x28] sm:$0xff] %vm1127_vm3, %v1114_v21 }
 0x997   : > { %v1455_v13 = vpop.permute.xlu0 %1454 }
 0x998   : > { %1477 = vst.msk [vmem:[%s3555_s5 + $0x10] sm:$0xff] %vm1474_vm4, %v1455_v13  ;;  %v1118_v8 = vpop.permute.xlu1 %1117 }
 0x999   : > { %1135 = vst.msk [vmem:[%s3555_s5 + $0x38] sm:$0xff] %vm1127_vm3, %v1118_v8 }
 0x99b   : > { %v1459_v34 = vpop.permute.xlu0 %1458 }
 0x99c   : > { %1479 = vst.msk [vmem:[%s3555_s5 + $0x20] sm:$0xff] %vm1474_vm4, %v1459_v34  ;;  %v1453_v31 = vpop.permute.xlu1 %1452 }
 0x99d   : > { %1476 = vst.msk [vmem:[%s3555_s5 + $0x8] sm:$0xff] %vm1474_vm4, %v1453_v31 }
 0x99f   : > { %v1463_v46 = vpop.permute.xlu0 %1462 }
 0x9a0   : > { %1481 = vst.msk [vmem:[%s3555_s5 + $0x30] sm:$0xff] %vm1474_vm4, %v1463_v46  ;;  %v1457_v26 = vpop.permute.xlu1 %1456 }
 0x9a1   : > { %1478 = vst.msk [vmem:[%s3555_s5 + $0x18] sm:$0xff] %vm1474_vm4, %v1457_v26 }
 0x9a4   : > { %v1461_v12 = vpop.permute.xlu1 %1460 }
 0x9a5   : > { %1480 = vst.msk [vmem:[%s3555_s5 + $0x28] sm:$0xff] %vm1474_vm4, %v1461_v12 }
 0x9a8   : > { %v1465_v10 = vpop.permute.xlu1 %1464 }
 0x9a9   : > { %1482 = vst.msk [vmem:[%s3555_s5 + $0x38] sm:$0xff] %vm1474_vm4, %v1465_v10 }
 0x9be   : > { %v2316_v58 = vpop.f32.mrb[24].mxu1 }
 0x9bf   : > { %v1783_v25 = vmul.f32 %v2571_v32, %v2316_v58  ;;  %v1742_v4 = vpop.f32.mrb[25].mxu1 }
 0x9c0   : > { %v1781_v22 = vmul.f32 %v2573_v27, %v1742_v4  ;;  %v2317_v3 = vpop.f32.mrb[26].mxu1 }
 0x9c1   : > { %v1784_v55 = vmul.f32 %v2575_v19, %v2317_v3  ;;  %1801 = vrot.lane.b32.xlu0 %v1783_v25, %s2800_s26  ;;  %v1745_v18 = vpop.f32.mrb[27].mxu1 }
 0x9c2   : > { %v1782_v41 = vmul.f32 %v2577_v40, %v1745_v18 }
 0x9c3   : > { %1803 = vrot.lane.b32.xlu1 %v1784_v55, %s2800_s26 }
 0x9c5   : > { %1797 = vrot.lane.b32.xlu0 %v1781_v22, %s2800_s26 }
 0x9c6   : > { %v2320_v37 = vpop.f32.mrb[28].mxu1 }
 0x9c7   : > { %v1787_v45 = vmul.f32 %v2579_v44, %v2320_v37  ;;  %v1758_v57 = vpop.f32.mrb[29].mxu1  ;;  %1799 = vrot.lane.b32.xlu1 %v1782_v41, %s2800_s26 }
 0x9c8   : > { %v1785_v47 = vmul.f32 %v2581_v49, %v1758_v57  ;;  %v2321_v28 = vpop.f32.mrb[30].mxu1 }
 0x9c9   : > { %v1788_v51 = vmul.f32 %v2583_v5, %v2321_v28  ;;  %v1761_v20 = vpop.f32.mrb[31].mxu1 }
 0x9ca   : > { %v1786_v38 = vmul.f32 %v2585_v17, %v1761_v20  ;;  %1805 = vrot.lane.b32.xlu0 %v1785_v47, %s2800_s26 }
 0x9cc   : > { %1807 = vrot.lane.b32.xlu1 %v1786_v38, %s2800_s26 }
 0x9ce   : > { %1809 = vrot.lane.b32.xlu0 %v1787_v45, %s2800_s26 }
 0x9d0   : > { %1811 = vrot.lane.b32.xlu1 %v1788_v51, %s2800_s26 }
 0xa33   : > { %v1802_v63 = vpop.permute.xlu0 %1801 }
 0xa34   : > { %1824 = vst.msk [vmem:[%s3555_s5 + $0x10] sm:$0xff] %vm1821_vm5, %v1802_v63 }
 0xa35   : > { %v1804_v60 = vpop.permute.xlu1 %1803 }
 0xa36   : > { %1825 = vst.msk [vmem:[%s3555_s5 + $0x18] sm:$0xff] %vm1821_vm5, %v1804_v60 }
 0xa37   : > { %v1798_v29 = vpop.permute.xlu0 %1797 }
 0xa38   : > { %1822 = vst.msk [vmem:[%s3555_s5] sm:$0xff] %vm1821_vm5, %v1798_v29 }
 0xa39   : > { %v1800_v39 = vpop.permute.xlu1 %1799 }
 0xa3a   : > { %1823 = vst.msk [vmem:[%s3555_s5 + $0x8] sm:$0xff] %vm1821_vm5, %v1800_v39 }
 0xa3c   : > { %v1806_v6 = vpop.permute.xlu0 %1805 }
 0xa3d   : > { %1826 = vst.msk [vmem:[%s3555_s5 + $0x20] sm:$0xff] %vm1821_vm5, %v1806_v6 }
 0xa3e   : > { %v1808_v0 = vpop.permute.xlu1 %1807 }
 0xa3f   : > { %1827 = vst.msk [vmem:[%s3555_s5 + $0x28] sm:$0xff] %vm1821_vm5, %v1808_v0 }
 0xa40   : > { %v1810_v35 = vpop.permute.xlu0 %1809 }
 0xa41   : > { %1828 = vst.msk [vmem:[%s3555_s5 + $0x30] sm:$0xff] %vm1821_vm5, %v1810_v35 }
 0xa42   : > { %v1812_v43 = vpop.permute.xlu1 %1811 }
 0xa43   : > { %1829 = vst.msk [vmem:[%s3555_s5 + $0x38] sm:$0xff] %vm1821_vm5, %v1812_v43 }
 0xa44   : > { %2718 = shalt.err (!%p2715_p4)
}
 0xa45   : > { %s2719_s6 = scalar_lea.hbm %s3656_s20, 1024  ;;  %s2723_s13 = scalar_lea.hbm %s3711_s4, 2048 }
 0xa46   : > { %p2720_p9 = scmp.ne.s32.totalorder %s3656_s20, %s2719_s6  ;;  %p2724_p8 = scmp.lt.u32.totalorder %s3656_s20, %s3711_s4 }
 0xa47   : > { %p2725_p13 = scmp.lt.u32.totalorder %s2723_s13, %s2719_s6  ;;  %p2727_p10 = scmp.lt.u32.totalorder %s2719_s6, %s3656_s20 }
 0xa48   : > { %p2721_p0 = pnand %p2720_p9, %p2977_p5 }
 0xa49   : > { %p2726_p6 = por %p2725_p13, %p2724_p8 }
 0xa4a   : > { %p2722_p11 = pneg %p2721_p0 }
 0xa4b   : > { %p2728_p3 = por %p2727_p10, %p2726_p6 }
 0xa4d   : > { %p2729_p7 = pnand %p2728_p3, %p2722_p11 }
 0xa4f   : > { %2732 = shalt.err (!%p2729_p7)
}
 0xa50   : > { %s2802_s28 = smov 128  }
 0xa51   : > { %2368 = dma.vmem_to_hbm [thread:$0]  (%p2977_p5), %s3660_s21, 1024, %s3656_s20, %s1831_s19, %s2802_s28, %s2802_s28, %s2798_s9  }
 0xa52 PF: > { %s1859_s23 = sand.u32 1, %s2767_s15   ;;  %p3729_p12 = scmp.ne.s32.totalorder %s3716_s22, 0 }
 0xa53   : > { %p3730_p1 = scmp.ge.s32.totalorder %s2779_s18, 2  ;;  %s1860_s14 = scalar_lea.sflag [#allocation5], %s1859_s23 }
 0xa55   : > { %p2385_p2 = pnand %p3730_p1, %p3729_p12 }
 0xa57   : > { %2762 = dma.done.wait (!%p2385_p2), %s1860_s14, 1024  }
 0xa58   : > { %2764 = vsyncadd (!%p2385_p2), %s1860_s14, 4294966272  ;;  %p19_p4 = scmp.ge.s32.totalorder %s2963_s10, 4   ;;  %s3731_s15 = smov %s2771_s16 }
 0xa59   : > { %s3732_s16 = smov %s2775_s17  ;;  %s3733_s17 = smov %s2973_s24 }
 0xa5a   : > { %s3734_s18 = smov %s2963_s10  ;;  %21 = sbr.rel (!%p19_p4) target bundleno = 7 (0x7), region = 93 }
 0xa61   :  { %1865 = vsyncpa [#allocation4], 1 }
 0xa62   :  { %1867 = vsyncpa [#allocation4 + $0x1], 1 }
 0xa63   :  { %1868 = vsyncpa [#allocation7], 1 }
 0xa64   :  { %1869 = vsyncpa [#allocation10], 1 }
 0xa65   :  { %1870 = vsyncpa [#allocation5], 1 }
 0xa66   :  { %1872 = vsyncpa [#allocation5 + $0x1], 1 }

</bundles_post_ra>
